<compile_context>
chip_gen: v7x
topology: tpu7x:2x2x1
jax: 0.10.0
libtpu: 0.0.40
codegen_flags: <defaults>
</compile_context>

<pallas_src>
import functools
import math

import jax
import jax.numpy as jnp
from jax.experimental import pallas as pl
from jax.experimental.pallas import tpu as pltpu


# ---------------------------------------------------------------------------
# small helpers
# ---------------------------------------------------------------------------

def _round_up(x, m):
    return ((x + m - 1) // m) * m


def _pad2(x, r, c):
    return jnp.pad(x, ((0, r - x.shape[0]), (0, c - x.shape[1])))


def _pick_tm(m):
    if m >= 1024:
        return 512
    if m >= 512:
        return 256
    if m >= 256:
        return 128
    return _round_up(m, 16)          # 16 = bf16 sublane packing granularity


# ---------------------------------------------------------------------------
# Pallas kernels
# ---------------------------------------------------------------------------

def _mm_bn_kernel(*refs, relu, has_res):
    """Tiled matmul, fused per-channel scale/bias (BN), optional residual + ReLU."""
    if has_res:
        a_ref, b_ref, s_ref, t_ref, r_ref, o_ref, acc_ref = refs
    else:
        a_ref, b_ref, s_ref, t_ref, o_ref, acc_ref = refs
        r_ref = None

    @pl.when(pl.program_id(2) == 0)
    def _():
        acc_ref[...] = jnp.zeros_like(acc_ref)

    acc_ref[...] += jnp.dot(a_ref[...], b_ref[...],
                            preferred_element_type=jnp.float32)

    @pl.when(pl.program_id(2) == pl.num_programs(2) - 1)
    def _():
        y = acc_ref[...] * s_ref[...] + t_ref[...]
        if has_res:
            y = y + r_ref[...].astype(jnp.float32)
        if relu:
            y = jnp.maximum(y, 0.0)
        o_ref[...] = y.astype(o_ref.dtype)


def _conv_window_kernel(a0_ref, a1_ref, w_ref, s_ref, t_ref, o_ref, *,
                        wp8, tm, kh, kw, relu):
    """Stride-1 KxK conv block as a sum of tap-shifted MXU matmuls.

    a0 = (tm, cin) rows of the flattened padded activation, a1 = the small
    (kh-1)*wp8 row halo that follows it.  Tap (di, dj) is the row window
    [di*wp8 + dj, di*wp8 + dj + tm): one static sublane shift per dj (kw total)
    plus sublane-aligned slices per di (wp8 is a multiple of 8)."""
    cin = a0_ref.shape[-1]
    window = jnp.concatenate(
        [a0_ref[0], a1_ref[0], jnp.zeros((8, cin), a0_ref.dtype)], axis=0)
    acc = None
    for dj in range(kw):
        shifted = window if dj == 0 else window[dj:]
        for di in range(kh):
            tap = shifted[di * wp8:di * wp8 + tm]
            part = jnp.dot(tap, w_ref[di * kw + dj],
                           preferred_element_type=jnp.float32)
            acc = part if acc is None else acc + part
    y = acc * s_ref[...] + t_ref[...]
    if relu:
        y = jnp.maximum(y, 0.0)
    o_ref[0] = y.astype(o_ref.dtype)


def _maxpool_kernel(p_ref, o_ref):
    # p_ref: (9, TM, C) stacked pooling-window taps; vectorised max over taps.
    o_ref[...] = jnp.max(p_ref[...], axis=0)


def _avgpool_kernel(x_ref, o_ref, *, inv_hw):
    x = x_ref[...].astype(jnp.float32)
    o_ref[...] = jnp.sum(x, axis=1) * inv_hw


def _linear_norm_kernel(x_ref, w_ref, b_ref, o_ref, *, normalize):
    y = jnp.dot(x_ref[...], w_ref[...], preferred_element_type=jnp.float32)
    y = y + b_ref[...]
    if normalize:
        n = jnp.sqrt(jnp.sum(y * y, axis=-1, keepdims=True))
        y = y / jnp.maximum(n, 1e-12)          # torch.nn.functional.normalize
    o_ref[...] = y.astype(o_ref.dtype)


# ---------------------------------------------------------------------------
# Pallas wrappers
# ---------------------------------------------------------------------------

def matmul_bn_act(a, w, scale, bias, relu, res=None, out_dtype=jnp.bfloat16):
    """(M,K)@(K,N) * scale + bias [+ res] [+ relu]; bf16 MXU, f32 accumulation."""
    M, K = a.shape
    N = w.shape[1]
    tm = _pick_tm(M)
    tk = K if K <= 256 else 256
    tn = N if N <= 128 else min(N, 1024)
    pm, pk, pn = _round_up(M, tm), _round_up(K, tk), _round_up(N, tn)

    a_p = a.astype(jnp.bfloat16)
    if (pm, pk) != (M, K):
        a_p = jnp.pad(a_p, ((0, pm - M), (0, pk - K)))
    w_p = w.astype(jnp.bfloat16)
    if w_p.shape != (pk, pn):
        w_p = _pad2(w_p, pk, pn)
    s_p = scale.reshape(1, -1).astype(jnp.float32)
    t_p = bias.reshape(1, -1).astype(jnp.float32)
    if s_p.shape != (1, pn):
        s_p = _pad2(s_p, 1, pn)
        t_p = _pad2(t_p, 1, pn)

    in_specs = [
        pl.BlockSpec((tm, tk), lambda i, j, k: (i, k)),
        pl.BlockSpec((tk, tn), lambda i, j, k: (k, j)),
        pl.BlockSpec((1, tn), lambda i, j, k: (0, j)),
        pl.BlockSpec((1, tn), lambda i, j, k: (0, j)),
    ]
    args = [a_p, w_p, s_p, t_p]
    has_res = res is not None
    if has_res:
        r_p = res.astype(jnp.bfloat16)
        if r_p.shape != (pm, pn):
            r_p = _pad2(r_p, pm, pn)
        in_specs.append(pl.BlockSpec((tm, tn), lambda i, j, k: (i, j)))
        args.append(r_p)

    grid = (pm // tm, pn // tn, pk // tk)
    out = pl.pallas_call(
        functools.partial(_mm_bn_kernel, relu=relu, has_res=has_res),
        out_shape=jax.ShapeDtypeStruct((pm, pn), out_dtype),
        grid_spec=pltpu.PrefetchScalarGridSpec(
            num_scalar_prefetch=0,
            grid=grid,
            in_specs=in_specs,
            out_specs=pl.BlockSpec((tm, tn), lambda i, j, k: (i, j)),
            scratch_shapes=[pltpu.VMEM((tm, tn), jnp.float32)],
        ),
        compiler_params=pltpu.CompilerParams(
            dimension_semantics=("parallel", "parallel", "arbitrary")),
    )(*args)
    return out[:M, :N]


def conv_window(x, w3, scale, bias, kh, kw, pad, relu, out_dtype=jnp.bfloat16):
    """Stride-1 kh x kw conv (NHWC) with fused BN scale/bias (+ReLU), no im2col."""
    B, H, W, cin = x.shape
    cout = w3.shape[-1]
    Hp, Wp = H + 2 * pad, W + 2 * pad
    Ho, Wo = Hp - kh + 1, Wp - kw + 1
    Wp8 = _round_up(Wp, 8)

    # rows of the padded image per grid block: divisible by (kh-1) (halo index)
    # and even (bf16 sublane packing of tm = rh*Wp8).  ~256 flattened rows max.
    g = 6 if (kh - 1) == 3 else 2
    rh = g
    while (rh + g) * Wp8 <= 256 and rh < Ho:
        rh += g
    tm = rh * Wp8
    num_i = -(-Ho // rh)
    Hpad = (num_i + 1) * rh               # >= Hp, leaves room for the halo rows
    halo = (kh - 1) * Wp8
    q = rh // (kh - 1)

    xp = jnp.pad(x.astype(jnp.bfloat16),
                 ((0, 0), (pad, Hpad - H - pad), (pad, Wp8 - W - pad), (0, 0)))
    xf = xp.reshape(B, Hpad * Wp8, cin)

    tn = min(cout, 256)
    nj = cout // tn

    a0_spec = lambda b, i, j: (b, i, 0)
    a1_spec = lambda b, i, j: (b, (i + 1) * q, 0)
    w_spec = lambda b, i, j: (0, 0, j)
    v_spec = lambda b, i, j: (0, j)
    o_spec = lambda b, i, j: (b, i, j)

    act_bytes = B * Hpad * Wp8 * cin * 2
    w_bytes = kh * kw * cin * cout * 2
    if nj > 1 and w_bytes * B * num_i > act_bytes * nj:
        # weight-stationary grid order (late layers: big weights, tiny spatial).
        grid = (nj, B, num_i)

        def _r(f):
            return lambda j, b, i: f(b, i, j)

        a0_spec, a1_spec, w_spec, v_spec, o_spec = (
            _r(a0_spec), _r(a1_spec), _r(w_spec), _r(v_spec), _r(o_spec))
    else:
        grid = (B, num_i, nj)

    out = pl.pallas_call(
        functools.partial(_conv_window_kernel, wp8=Wp8, tm=tm, kh=kh, kw=kw,
                          relu=relu),
        out_shape=jax.ShapeDtypeStruct((B, num_i * tm, cout), out_dtype),
        grid_spec=pltpu.PrefetchScalarGridSpec(
            num_scalar_prefetch=0,
            grid=grid,
            in_specs=[
                pl.BlockSpec((1, tm, cin), a0_spec),
                pl.BlockSpec((1, halo, cin), a1_spec),
                pl.BlockSpec((kh * kw, cin, tn), w_spec),
                pl.BlockSpec((1, tn), v_spec),
                pl.BlockSpec((1, tn), v_spec),
            ],
            out_specs=pl.BlockSpec((1, tm, tn), o_spec),
        ),
        compiler_params=pltpu.CompilerParams(
            dimension_semantics=("parallel", "parallel", "parallel")),
    )(xf, xf, w3, scale, bias)

    out = out.reshape(B, num_i * rh, Wp8, cout)[:, :Ho, :Wo, :]
    return out


def _space_to_depth(x, pad):
    """Pad by `pad`, then fold every 2x2 spatial patch into channels (s2d by 2)."""
    x = x.astype(jnp.bfloat16)
    xp = jnp.pad(x, ((0, 0), (pad, pad), (pad, pad), (0, 0)))
    B, He, We, C = xp.shape
    if He % 2:
        xp = jnp.pad(xp, ((0, 0), (0, 1), (0, 0), (0, 0)))
        He += 1
    if We % 2:
        xp = jnp.pad(xp, ((0, 0), (0, 0), (0, 1), (0, 0)))
        We += 1
    xs = xp.reshape(B, He // 2, 2, We // 2, 2, C)
    xs = jnp.transpose(xs, (0, 1, 3, 2, 4, 5)).reshape(B, He // 2, We // 2, 4 * C)
    return xs


def apply_conv(x, c, relu, residual=None):
    """Dispatch a packed conv+BN(+ReLU)(+residual) to the right Pallas kernel."""
    if c['kind'] == 'mm':                      # 1x1 conv -> tiled matmul
        if c['stride'] != 1:
            # TODO(synk): fold the stride-2 subsample into the BlockSpec index map.
            x = x[:, ::c['stride'], ::c['stride'], :]
        B, H, W, cin = x.shape
        cout = c['w'].shape[1]
        a = x.reshape(B * H * W, cin)
        res = None if residual is None else residual.reshape(B * H * W, cout)
        y = matmul_bn_act(a, c['w'], c['scale'], c['bias'], relu, res=res)
        return y.reshape(B, H, W, cout)

    assert residual is None
    if c['stride'] == 2:                       # strided conv via space-to-depth
        xs = _space_to_depth(x, c['pad'])
        return conv_window(xs, c['w'], c['scale'], c['bias'],
                           c['kh'], c['kw'], 0, relu)
    return conv_window(x, c['w'], c['scale'], c['bias'],
                       c['kh'], c['kw'], c['pad'], relu)


def maxpool_3x3_s2(x):
    B, H, W, C = x.shape
    Ho = (H + 2 - 3) // 2 + 1
    Wo = (W + 2 - 3) // 2 + 1
    neg = float(jnp.finfo(x.dtype).min)
    xp = jnp.pad(x, ((0, 0), (1, 1), (1, 1), (0, 0)), constant_values=neg)
    cols = [xp[:, di:di + Ho * 2:2, dj:dj + Wo * 2:2, :]
            for di in range(3) for dj in range(3)]
    p = jnp.stack(cols, axis=0).reshape(9, B * Ho * Wo, C)

    M, CC = B * Ho * Wo, C
    if C < 128 and 128 % C == 0 and M % (128 // C) == 0:
        f = 128 // C                   # lane-dense: fold f spatial positions into lanes
        p = p.reshape(9, M // f, C * f)
        M, CC = M // f, C * f
    tm = min(1024, _round_up(M, 16))
    pm = _round_up(M, tm)
    if pm != M:
        p = jnp.pad(p, ((0, 0), (0, pm - M), (0, 0)), constant_values=neg)

    out = pl.pallas_call(
        _maxpool_kernel,
        out_shape=jax.ShapeDtypeStruct((pm, CC), x.dtype),
        grid_spec=pltpu.PrefetchScalarGridSpec(
            num_scalar_prefetch=0,
            grid=(pm // tm,),
            in_specs=[pl.BlockSpec((9, tm, CC), lambda i: (0, i, 0))],
            out_specs=pl.BlockSpec((tm, CC), lambda i: (i, 0)),
        ),
        compiler_params=pltpu.CompilerParams(dimension_semantics=("parallel",)),
    )(p)
    return out[:M].reshape(B, Ho, Wo, C)


def global_avgpool(x):
    B, H, W, C = x.shape
    HW = H * W
    x3 = x.reshape(B, HW, C)
    B8 = _round_up(B, 8)
    if B8 != B:
        x3 = jnp.pad(x3, ((0, B8 - B), (0, 0), (0, 0)))
    out = pl.pallas_call(
        functools.partial(_avgpool_kernel, inv_hw=1.0 / HW),
        out_shape=jax.ShapeDtypeStruct((B8, C), jnp.float32),
        grid_spec=pltpu.PrefetchScalarGridSpec(
            num_scalar_prefetch=0,
            grid=(B8 // 8,),
            in_specs=[pl.BlockSpec((8, HW, C), lambda i: (i, 0, 0))],
            out_specs=pl.BlockSpec((8, C), lambda i: (i, 0)),
        ),
        compiler_params=pltpu.CompilerParams(dimension_semantics=("parallel",)),
    )(x3)
    return out[:B]


def linear_norm(x, w, b, normalize):
    B, K = x.shape
    N = w.shape[1]
    pn = _round_up(N, 128)
    tb = 128 if B > 128 else _round_up(B, 8)
    pb = _round_up(B, tb)
    x_p = _pad2(x.astype(jnp.bfloat16), pb, K)
    w_p = w.astype(jnp.bfloat16)
    if w_p.shape != (K, pn):
        w_p = _pad2(w_p, K, pn)
    b_p = b.reshape(1, -1).astype(jnp.float32)
    if b_p.shape != (1, pn):
        b_p = _pad2(b_p, 1, pn)
    out = pl.pallas_call(
        functools.partial(_linear_norm_kernel, normalize=normalize),
        out_shape=jax.ShapeDtypeStruct((pb, pn), jnp.float32),
        grid_spec=pltpu.PrefetchScalarGridSpec(
            num_scalar_prefetch=0,
            grid=(pb // tb,),
            in_specs=[pl.BlockSpec((tb, K), lambda i: (i, 0)),
                      pl.BlockSpec((K, pn), lambda i: (0, 0)),
                      pl.BlockSpec((1, pn), lambda i: (0, 0))],
            out_specs=pl.BlockSpec((tb, pn), lambda i: (i, 0)),
        ),
        compiler_params=pltpu.CompilerParams(dimension_semantics=("parallel",)),
    )(x_p, w_p, b_p)
    return out[:B, :N]


# ---------------------------------------------------------------------------
# Parameter init (deterministic, synthetic) with device-layout packing
# ---------------------------------------------------------------------------

def _fold_bn(gamma, beta, mean, var, eps=1e-5):
    scale = gamma / jnp.sqrt(var + eps)
    bias = beta - mean * scale
    return scale, bias


def _s2d_weight(w):
    """Rearrange a stride-2 KxK conv weight into a stride-1 ceil(K/2)^2 conv on 4*cin."""
    kh, kw, cin, cout = w.shape
    kh2, kw2 = (kh + 1) // 2, (kw + 1) // 2
    wpad = jnp.pad(w, ((0, 2 * kh2 - kh), (0, 2 * kw2 - kw), (0, 0), (0, 0)))
    wn = wpad.reshape(kh2, 2, kw2, 2, cin, cout)
    wn = jnp.transpose(wn, (0, 2, 1, 3, 4, 5)).reshape(kh2, kw2, 4 * cin, cout)
    return wn


def _pack_conv(w, scale, bias, stride, pad):
    """Pre-cast / pre-reshape conv+BN params once (no per-forward pad/cast)."""
    kh, kw, cin, cout = w.shape
    scale = scale.reshape(1, cout).astype(jnp.float32)
    bias = bias.reshape(1, cout).astype(jnp.float32)
    if kh == 1 and kw == 1:
        return dict(kind='mm', stride=stride,
                    w=w.reshape(cin, cout).astype(jnp.bfloat16),
                    scale=scale, bias=bias)
    if stride == 2:
        w = _s2d_weight(w)
        kh, kw, cin = w.shape[0], w.shape[1], w.shape[2]
    return dict(kind='win', stride=stride, pad=pad, kh=kh, kw=kw,
                w=w.reshape(kh * kw, cin, cout).astype(jnp.bfloat16),
                scale=scale, bias=bias)


def _make_conv_bn(key, kh, kw, cin, cout, stride, pad):
    k1, k2, k3 = jax.random.split(key, 3)
    std = math.sqrt(2.0 / (kh * kw * cin))
    w = jax.random.normal(k1, (kh, kw, cin, cout), jnp.float32) * std
    gamma = 1.0 + 0.1 * jax.random.normal(k2, (cout,), jnp.float32)
    beta = 0.1 * jax.random.normal(k3, (cout,), jnp.float32)
    scale, bias = _fold_bn(gamma, beta, jnp.zeros((cout,)), jnp.ones((cout,)))
    return _pack_conv(w, scale, bias, stride, pad)


def init_params(key, embed_dim=128):
    keys = iter(jax.random.split(key, 256))
    params = {'stem': _make_conv_bn(next(keys), 7, 7, 3, 64, stride=2, pad=3)}

    layer_cfg = [(64, 3, 1), (128, 4, 2), (256, 6, 2), (512, 3, 2)]
    in_c = 64
    layers = []
    for mid, nblocks, stride in layer_cfg:
        out_c = mid * 4
        blocks = []
        for b in range(nblocks):
            s = stride if b == 0 else 1
            blk = {
                'conv1': _make_conv_bn(next(keys), 1, 1, in_c, mid, 1, 0),
                'conv2': _make_conv_bn(next(keys), 3, 3, mid, mid, s, 1),
                'conv3': _make_conv_bn(next(keys), 1, 1, mid, out_c, 1, 0),
            }
            if b == 0:
                blk['down'] = _make_conv_bn(next(keys), 1, 1, in_c, out_c, s, 0)
            blocks.append(blk)
            in_c = out_c
        layers.append(blocks)
    params['layers'] = layers

    params['fc_w'] = (jax.random.normal(next(keys), (2048, embed_dim), jnp.float32)
                      / math.sqrt(2048.0)).astype(jnp.bfloat16)
    params['fc_b'] = (0.01 * jax.random.normal(next(keys), (embed_dim,), jnp.float32)
                      ).reshape(1, embed_dim)
    return params


# ---------------------------------------------------------------------------
# Forward pass
# ---------------------------------------------------------------------------

def bottleneck(x, blk):
    if 'down' in blk:
        identity = apply_conv(x, blk['down'], relu=False)
    else:
        identity = x
    out = apply_conv(x, blk['conv1'], relu=True)
    out = apply_conv(out, blk['conv2'], relu=True)
    # residual add + ReLU fused into the last 1x1 conv's matmul epilogue
    out = apply_conv(out, blk['conv3'], relu=True, residual=identity)
    return out


def resnet50_forward(params, x_nchw, normalize):
    # PyTorch NCHW -> NHWC
    x = jnp.transpose(x_nchw, (0, 2, 3, 1))
    # stem: conv1(7x7/s2 via space-to-depth) -> bn -> relu -> maxpool
    x = apply_conv(x, params['stem'], relu=True)
    x = maxpool_3x3_s2(x)
    # layer1..layer4 (bottleneck blocks)
    for blocks in params['layers']:
        for blk in blocks:
            x = bottleneck(x, blk)
    # global average pool + flatten (f32), last_linear (+ L2 normalize unless 'npair')
    x = global_avgpool(x)
    return linear_norm(x, params['fc_w'], params['fc_b'], normalize)


# ---------------------------------------------------------------------------

if __name__ == "__main__":
    LOSS = "margin"            # opt.loss; anything != 'npair' -> L2-normalized output
    EMBED_DIM = 128            # opt.embed_dim

    key = jax.random.PRNGKey(0)
    k_x, k_p = jax.random.split(key)
    x = jax.random.normal(k_x, (2, 3, 32, 32), jnp.float32)   # small NCHW input
    params = init_params(k_p, embed_dim=EMBED_DIM)

    out = resnet50_forward(params, x, normalize=(LOSS != "npair"))
    out = jax.block_until_ready(out)

    assert out.shape == (2, EMBED_DIM), out.shape
    assert bool(jnp.all(jnp.isfinite(out)))
    print("KERNEL_OK")
</pallas_src>

<mosaic_0001>
module attributes {stable_mosaic.version = 11 : i64} {
  func.func @_conv_window_kernel(%arg0: i32, %arg1: i32, %arg2: i32, %arg3: memref<1x144x12xbf16, #tpu.memory_space<vmem>>, %arg4: memref<1x72x12xbf16, #tpu.memory_space<vmem>>, %arg5: memref<16x12x64xbf16, #tpu.memory_space<vmem>>, %arg6: memref<1x64xf32, #tpu.memory_space<vmem>>, %arg7: memref<1x64xf32, #tpu.memory_space<vmem>>, %arg8: memref<1x144x64xbf16, #tpu.memory_space<vmem>>) attributes {dimension_semantics = [#tpu.dimension_semantics<parallel>, #tpu.dimension_semantics<parallel>, #tpu.dimension_semantics<parallel>], iteration_bounds = array<i64: 2, 3, 1>, scalar_prefetch = 0 : i64, scratch_operands = 0 : i64, tpu.core_type = #tpu.core_type<tc>, window_params = [{transform_indices = @transform_0, window_bounds = array<i64: 1, 144, 12>}, {transform_indices = @transform_1, window_bounds = array<i64: 1, 72, 12>}, {transform_indices = @transform_2, window_bounds = array<i64: 16, 12, 64>}, {transform_indices = @transform_3, window_bounds = array<i64: 1, 64>}, {transform_indices = @transform_4, window_bounds = array<i64: 1, 64>}, {transform_indices = @transform_5, window_bounds = array<i64: 1, 144, 64>}]} {
    %c0 = arith.constant 0 : index
    %c0_0 = arith.constant 0 : index
    %c0_1 = arith.constant 0 : index
    %0 = vector.load %arg3[%c0, %c0_0, %c0_1] : memref<1x144x12xbf16, #tpu.memory_space<vmem>>, vector<1x144x12xbf16>
    %1 = vector.shape_cast %0 : vector<1x144x12xbf16> to vector<144x12xbf16>
    %c0_2 = arith.constant 0 : index
    %c0_3 = arith.constant 0 : index
    %c0_4 = arith.constant 0 : index
    %2 = vector.load %arg4[%c0_2, %c0_3, %c0_4] : memref<1x72x12xbf16, #tpu.memory_space<vmem>>, vector<1x72x12xbf16>
    %3 = vector.shape_cast %2 : vector<1x72x12xbf16> to vector<72x12xbf16>
    %cst = arith.constant 0.000000e+00 : bf16
    %4 = vector.broadcast %cst : bf16 to vector<8x12xbf16>
    %5 = tpu.concatenate %1, %3, %4 in 0 : vector<144x12xbf16>, vector<72x12xbf16>, vector<8x12xbf16> -> vector<224x12xbf16>
    %6 = vector.extract_strided_slice %5 {offsets = [0, 0], sizes = [144, 12], strides = [1, 1]} : vector<224x12xbf16> to vector<144x12xbf16>
    %c0_5 = arith.constant 0 : index
    %c0_6 = arith.constant 0 : index
    %c0_7 = arith.constant 0 : index
    %7 = vector.load %arg5[%c0_5, %c0_6, %c0_7] : memref<16x12x64xbf16, #tpu.memory_space<vmem>>, vector<1x12x64xbf16>
    %8 = vector.shape_cast %7 : vector<1x12x64xbf16> to vector<12x64xbf16>
    %cst_8 = arith.constant dense<0.000000e+00> : vector<144x64xf32>
    %9 = tpu.matmul %6, %8, %cst_8 {dimension_numbers = #tpu.dot_dimension_numbers<[1], [0], [0], [1], [0, 0, 1, 1], [], []>} : vector<144x12xbf16>, vector<12x64xbf16>, vector<144x64xf32> -> vector<144x64xf32>
    %10 = vector.extract_strided_slice %5 {offsets = [24, 0], sizes = [144, 12], strides = [1, 1]} : vector<224x12xbf16> to vector<144x12xbf16>
    %c4 = arith.constant 4 : index
    %c0_9 = arith.constant 0 : index
    %c0_10 = arith.constant 0 : index
    %11 = vector.load %arg5[%c4, %c0_9, %c0_10] : memref<16x12x64xbf16, #tpu.memory_space<vmem>>, vector<1x12x64xbf16>
    %12 = vector.shape_cast %11 : vector<1x12x64xbf16> to vector<12x64xbf16>
    %cst_11 = arith.constant dense<0.000000e+00> : vector<144x64xf32>
    %13 = tpu.matmul %10, %12, %cst_11 {dimension_numbers = #tpu.dot_dimension_numbers<[1], [0], [0], [1], [0, 0, 1, 1], [], []>} : vector<144x12xbf16>, vector<12x64xbf16>, vector<144x64xf32> -> vector<144x64xf32>
    %14 = arith.addf %9, %13 : vector<144x64xf32>
    %15 = vector.extract_strided_slice %5 {offsets = [48, 0], sizes = [144, 12], strides = [1, 1]} : vector<224x12xbf16> to vector<144x12xbf16>
    %c8 = arith.constant 8 : index
    %c0_12 = arith.constant 0 : index
    %c0_13 = arith.constant 0 : index
    %16 = vector.load %arg5[%c8, %c0_12, %c0_13] : memref<16x12x64xbf16, #tpu.memory_space<vmem>>, vector<1x12x64xbf16>
    %17 = vector.shape_cast %16 : vector<1x12x64xbf16> to vector<12x64xbf16>
    %cst_14 = arith.constant dense<0.000000e+00> : vector<144x64xf32>
    %18 = tpu.matmul %15, %17, %cst_14 {dimension_numbers = #tpu.dot_dimension_numbers<[1], [0], [0], [1], [0, 0, 1, 1], [], []>} : vector<144x12xbf16>, vector<12x64xbf16>, vector<144x64xf32> -> vector<144x64xf32>
    %19 = arith.addf %14, %18 : vector<144x64xf32>
    %20 = vector.extract_strided_slice %5 {offsets = [72, 0], sizes = [144, 12], strides = [1, 1]} : vector<224x12xbf16> to vector<144x12xbf16>
    %c12 = arith.constant 12 : index
    %c0_15 = arith.constant 0 : index
    %c0_16 = arith.constant 0 : index
    %21 = vector.load %arg5[%c12, %c0_15, %c0_16] : memref<16x12x64xbf16, #tpu.memory_space<vmem>>, vector<1x12x64xbf16>
    %22 = vector.shape_cast %21 : vector<1x12x64xbf16> to vector<12x64xbf16>
    %cst_17 = arith.constant dense<0.000000e+00> : vector<144x64xf32>
    %23 = tpu.matmul %20, %22, %cst_17 {dimension_numbers = #tpu.dot_dimension_numbers<[1], [0], [0], [1], [0, 0, 1, 1], [], []>} : vector<144x12xbf16>, vector<12x64xbf16>, vector<144x64xf32> -> vector<144x64xf32>
    %24 = arith.addf %19, %23 : vector<144x64xf32>
    %25 = vector.extract_strided_slice %5 {offsets = [1, 0], sizes = [223, 12], strides = [1, 1]} : vector<224x12xbf16> to vector<223x12xbf16>
    %26 = vector.extract_strided_slice %25 {offsets = [0, 0], sizes = [144, 12], strides = [1, 1]} : vector<223x12xbf16> to vector<144x12xbf16>
    %c1 = arith.constant 1 : index
    %c0_18 = arith.constant 0 : index
    %c0_19 = arith.constant 0 : index
    %27 = vector.load %arg5[%c1, %c0_18, %c0_19] : memref<16x12x64xbf16, #tpu.memory_space<vmem>>, vector<1x12x64xbf16>
    %28 = vector.shape_cast %27 : vector<1x12x64xbf16> to vector<12x64xbf16>
    %cst_20 = arith.constant dense<0.000000e+00> : vector<144x64xf32>
    %29 = tpu.matmul %26, %28, %cst_20 {dimension_numbers = #tpu.dot_dimension_numbers<[1], [0], [0], [1], [0, 0, 1, 1], [], []>} : vector<144x12xbf16>, vector<12x64xbf16>, vector<144x64xf32> -> vector<144x64xf32>
    %30 = arith.addf %24, %29 : vector<144x64xf32>
    %31 = vector.extract_strided_slice %25 {offsets = [24, 0], sizes = [144, 12], strides = [1, 1]} : vector<223x12xbf16> to vector<144x12xbf16>
    %c5 = arith.constant 5 : index
    %c0_21 = arith.constant 0 : index
    %c0_22 = arith.constant 0 : index
    %32 = vector.load %arg5[%c5, %c0_21, %c0_22] : memref<16x12x64xbf16, #tpu.memory_space<vmem>>, vector<1x12x64xbf16>
    %33 = vector.shape_cast %32 : vector<1x12x64xbf16> to vector<12x64xbf16>
    %cst_23 = arith.constant dense<0.000000e+00> : vector<144x64xf32>
    %34 = tpu.matmul %31, %33, %cst_23 {dimension_numbers = #tpu.dot_dimension_numbers<[1], [0], [0], [1], [0, 0, 1, 1], [], []>} : vector<144x12xbf16>, vector<12x64xbf16>, vector<144x64xf32> -> vector<144x64xf32>
    %35 = arith.addf %30, %34 : vector<144x64xf32>
    %36 = vector.extract_strided_slice %25 {offsets = [48, 0], sizes = [144, 12], strides = [1, 1]} : vector<223x12xbf16> to vector<144x12xbf16>
    %c9 = arith.constant 9 : index
    %c0_24 = arith.constant 0 : index
    %c0_25 = arith.constant 0 : index
    %37 = vector.load %arg5[%c9, %c0_24, %c0_25] : memref<16x12x64xbf16, #tpu.memory_space<vmem>>, vector<1x12x64xbf16>
    %38 = vector.shape_cast %37 : vector<1x12x64xbf16> to vector<12x64xbf16>
    %cst_26 = arith.constant dense<0.000000e+00> : vector<144x64xf32>
    %39 = tpu.matmul %36, %38, %cst_26 {dimension_numbers = #tpu.dot_dimension_numbers<[1], [0], [0], [1], [0, 0, 1, 1], [], []>} : vector<144x12xbf16>, vector<12x64xbf16>, vector<144x64xf32> -> vector<144x64xf32>
    %40 = arith.addf %35, %39 : vector<144x64xf32>
    %41 = vector.extract_strided_slice %25 {offsets = [72, 0], sizes = [144, 12], strides = [1, 1]} : vector<223x12xbf16> to vector<144x12xbf16>
    %c13 = arith.constant 13 : index
    %c0_27 = arith.constant 0 : index
    %c0_28 = arith.constant 0 : index
    %42 = vector.load %arg5[%c13, %c0_27, %c0_28] : memref<16x12x64xbf16, #tpu.memory_space<vmem>>, vector<1x12x64xbf16>
    %43 = vector.shape_cast %42 : vector<1x12x64xbf16> to vector<12x64xbf16>
    %cst_29 = arith.constant dense<0.000000e+00> : vector<144x64xf32>
    %44 = tpu.matmul %41, %43, %cst_29 {dimension_numbers = #tpu.dot_dimension_numbers<[1], [0], [0], [1], [0, 0, 1, 1], [], []>} : vector<144x12xbf16>, vector<12x64xbf16>, vector<144x64xf32> -> vector<144x64xf32>
    %45 = arith.addf %40, %44 : vector<144x64xf32>
    %46 = vector.extract_strided_slice %5 {offsets = [2, 0], sizes = [222, 12], strides = [1, 1]} : vector<224x12xbf16> to vector<222x12xbf16>
    %47 = vector.extract_strided_slice %46 {offsets = [0, 0], sizes = [144, 12], strides = [1, 1]} : vector<222x12xbf16> to vector<144x12xbf16>
    %c2 = arith.constant 2 : index
    %c0_30 = arith.constant 0 : index
    %c0_31 = arith.constant 0 : index
    %48 = vector.load %arg5[%c2, %c0_30, %c0_31] : memref<16x12x64xbf16, #tpu.memory_space<vmem>>, vector<1x12x64xbf16>
    %49 = vector.shape_cast %48 : vector<1x12x64xbf16> to vector<12x64xbf16>
    %cst_32 = arith.constant dense<0.000000e+00> : vector<144x64xf32>
    %50 = tpu.matmul %47, %49, %cst_32 {dimension_numbers = #tpu.dot_dimension_numbers<[1], [0], [0], [1], [0, 0, 1, 1], [], []>} : vector<144x12xbf16>, vector<12x64xbf16>, vector<144x64xf32> -> vector<144x64xf32>
    %51 = arith.addf %45, %50 : vector<144x64xf32>
    %52 = vector.extract_strided_slice %46 {offsets = [24, 0], sizes = [144, 12], strides = [1, 1]} : vector<222x12xbf16> to vector<144x12xbf16>
    %c6 = arith.constant 6 : index
    %c0_33 = arith.constant 0 : index
    %c0_34 = arith.constant 0 : index
    %53 = vector.load %arg5[%c6, %c0_33, %c0_34] : memref<16x12x64xbf16, #tpu.memory_space<vmem>>, vector<1x12x64xbf16>
    %54 = vector.shape_cast %53 : vector<1x12x64xbf16> to vector<12x64xbf16>
    %cst_35 = arith.constant dense<0.000000e+00> : vector<144x64xf32>
    %55 = tpu.matmul %52, %54, %cst_35 {dimension_numbers = #tpu.dot_dimension_numbers<[1], [0], [0], [1], [0, 0, 1, 1], [], []>} : vector<144x12xbf16>, vector<12x64xbf16>, vector<144x64xf32> -> vector<144x64xf32>
    %56 = arith.addf %51, %55 : vector<144x64xf32>
    %57 = vector.extract_strided_slice %46 {offsets = [48, 0], sizes = [144, 12], strides = [1, 1]} : vector<222x12xbf16> to vector<144x12xbf16>
    %c10 = arith.constant 10 : index
    %c0_36 = arith.constant 0 : index
    %c0_37 = arith.constant 0 : index
    %58 = vector.load %arg5[%c10, %c0_36, %c0_37] : memref<16x12x64xbf16, #tpu.memory_space<vmem>>, vector<1x12x64xbf16>
    %59 = vector.shape_cast %58 : vector<1x12x64xbf16> to vector<12x64xbf16>
    %cst_38 = arith.constant dense<0.000000e+00> : vector<144x64xf32>
    %60 = tpu.matmul %57, %59, %cst_38 {dimension_numbers = #tpu.dot_dimension_numbers<[1], [0], [0], [1], [0, 0, 1, 1], [], []>} : vector<144x12xbf16>, vector<12x64xbf16>, vector<144x64xf32> -> vector<144x64xf32>
    %61 = arith.addf %56, %60 : vector<144x64xf32>
    %62 = vector.extract_strided_slice %46 {offsets = [72, 0], sizes = [144, 12], strides = [1, 1]} : vector<222x12xbf16> to vector<144x12xbf16>
    %c14 = arith.constant 14 : index
    %c0_39 = arith.constant 0 : index
    %c0_40 = arith.constant 0 : index
    %63 = vector.load %arg5[%c14, %c0_39, %c0_40] : memref<16x12x64xbf16, #tpu.memory_space<vmem>>, vector<1x12x64xbf16>
    %64 = vector.shape_cast %63 : vector<1x12x64xbf16> to vector<12x64xbf16>
    %cst_41 = arith.constant dense<0.000000e+00> : vector<144x64xf32>
    %65 = tpu.matmul %62, %64, %cst_41 {dimension_numbers = #tpu.dot_dimension_numbers<[1], [0], [0], [1], [0, 0, 1, 1], [], []>} : vector<144x12xbf16>, vector<12x64xbf16>, vector<144x64xf32> -> vector<144x64xf32>
    %66 = arith.addf %61, %65 : vector<144x64xf32>
    %67 = vector.extract_strided_slice %5 {offsets = [3, 0], sizes = [221, 12], strides = [1, 1]} : vector<224x12xbf16> to vector<221x12xbf16>
    %68 = vector.extract_strided_slice %67 {offsets = [0, 0], sizes = [144, 12], strides = [1, 1]} : vector<221x12xbf16> to vector<144x12xbf16>
    %c3 = arith.constant 3 : index
    %c0_42 = arith.constant 0 : index
    %c0_43 = arith.constant 0 : index
    %69 = vector.load %arg5[%c3, %c0_42, %c0_43] : memref<16x12x64xbf16, #tpu.memory_space<vmem>>, vector<1x12x64xbf16>
    %70 = vector.shape_cast %69 : vector<1x12x64xbf16> to vector<12x64xbf16>
    %cst_44 = arith.constant dense<0.000000e+00> : vector<144x64xf32>
    %71 = tpu.matmul %68, %70, %cst_44 {dimension_numbers = #tpu.dot_dimension_numbers<[1], [0], [0], [1], [0, 0, 1, 1], [], []>} : vector<144x12xbf16>, vector<12x64xbf16>, vector<144x64xf32> -> vector<144x64xf32>
    %72 = arith.addf %66, %71 : vector<144x64xf32>
    %73 = vector.extract_strided_slice %67 {offsets = [24, 0], sizes = [144, 12], strides = [1, 1]} : vector<221x12xbf16> to vector<144x12xbf16>
    %c7 = arith.constant 7 : index
    %c0_45 = arith.constant 0 : index
    %c0_46 = arith.constant 0 : index
    %74 = vector.load %arg5[%c7, %c0_45, %c0_46] : memref<16x12x64xbf16, #tpu.memory_space<vmem>>, vector<1x12x64xbf16>
    %75 = vector.shape_cast %74 : vector<1x12x64xbf16> to vector<12x64xbf16>
    %cst_47 = arith.constant dense<0.000000e+00> : vector<144x64xf32>
    %76 = tpu.matmul %73, %75, %cst_47 {dimension_numbers = #tpu.dot_dimension_numbers<[1], [0], [0], [1], [0, 0, 1, 1], [], []>} : vector<144x12xbf16>, vector<12x64xbf16>, vector<144x64xf32> -> vector<144x64xf32>
    %77 = arith.addf %72, %76 : vector<144x64xf32>
    %78 = vector.extract_strided_slice %67 {offsets = [48, 0], sizes = [144, 12], strides = [1, 1]} : vector<221x12xbf16> to vector<144x12xbf16>
    %c11 = arith.constant 11 : index
    %c0_48 = arith.constant 0 : index
    %c0_49 = arith.constant 0 : index
    %79 = vector.load %arg5[%c11, %c0_48, %c0_49] : memref<16x12x64xbf16, #tpu.memory_space<vmem>>, vector<1x12x64xbf16>
    %80 = vector.shape_cast %79 : vector<1x12x64xbf16> to vector<12x64xbf16>
    %cst_50 = arith.constant dense<0.000000e+00> : vector<144x64xf32>
    %81 = tpu.matmul %78, %80, %cst_50 {dimension_numbers = #tpu.dot_dimension_numbers<[1], [0], [0], [1], [0, 0, 1, 1], [], []>} : vector<144x12xbf16>, vector<12x64xbf16>, vector<144x64xf32> -> vector<144x64xf32>
    %82 = arith.addf %77, %81 : vector<144x64xf32>
    %83 = vector.extract_strided_slice %67 {offsets = [72, 0], sizes = [144, 12], strides = [1, 1]} : vector<221x12xbf16> to vector<144x12xbf16>
    %c15 = arith.constant 15 : index
    %c0_51 = arith.constant 0 : index
    %c0_52 = arith.constant 0 : index
    %84 = vector.load %arg5[%c15, %c0_51, %c0_52] : memref<16x12x64xbf16, #tpu.memory_space<vmem>>, vector<1x12x64xbf16>
    %85 = vector.shape_cast %84 : vector<1x12x64xbf16> to vector<12x64xbf16>
    %cst_53 = arith.constant dense<0.000000e+00> : vector<144x64xf32>
    %86 = tpu.matmul %83, %85, %cst_53 {dimension_numbers = #tpu.dot_dimension_numbers<[1], [0], [0], [1], [0, 0, 1, 1], [], []>} : vector<144x12xbf16>, vector<12x64xbf16>, vector<144x64xf32> -> vector<144x64xf32>
    %87 = arith.addf %82, %86 : vector<144x64xf32>
    %c0_54 = arith.constant 0 : index
    %c0_55 = arith.constant 0 : index
    %88 = vector.load %arg6[%c0_54, %c0_55] : memref<1x64xf32, #tpu.memory_space<vmem>>, vector<1x64xf32>
    %89 = vector.broadcast %88 : vector<1x64xf32> to vector<144x64xf32>
    %90 = arith.mulf %87, %89 : vector<144x64xf32>
    %c0_56 = arith.constant 0 : index
    %c0_57 = arith.constant 0 : index
    %91 = vector.load %arg7[%c0_56, %c0_57] : memref<1x64xf32, #tpu.memory_space<vmem>>, vector<1x64xf32>
    %92 = vector.broadcast %91 : vector<1x64xf32> to vector<144x64xf32>
    %93 = arith.addf %90, %92 : vector<144x64xf32>
    %cst_58 = arith.constant 0.000000e+00 : f32
    %94 = vector.broadcast %cst_58 : f32 to vector<144x64xf32>
    %95 = arith.maximumf %93, %94 : vector<144x64xf32>
    %96 = arith.truncf %95 : vector<144x64xf32> to vector<144x64xbf16>
    %c0_59 = arith.constant 0 : index
    %c0_60 = arith.constant 0 : index
    %c0_61 = arith.constant 0 : index
    %97 = vector.load %arg8[%c0_59, %c0_60, %c0_61] : memref<1x144x64xbf16, #tpu.memory_space<vmem>>, vector<1x144x64xbf16>
    %98 = vector.shape_cast %97 : vector<1x144x64xbf16> to vector<144x64xbf16>
    %99 = vector.shape_cast %96 : vector<144x64xbf16> to vector<1x144x64xbf16>
    tpu.vector_store %arg8[%c0_59, %c0_60, %c0_61], %99 {strides = array<i32>} : memref<1x144x64xbf16, #tpu.memory_space<vmem>>, vector<1x144x64xbf16>,
    return
  }
  func.func @transform_0(%arg0: i32, %arg1: i32, %arg2: i32) -> (i32, i32, i32) {
    %c0_i32 = arith.constant 0 : i32
    %c0_i32_0 = arith.constant 0 : i32
    return %arg0, %arg1, %c0_i32 : i32, i32, i32
  }
  func.func @transform_1(%arg0: i32, %arg1: i32, %arg2: i32) -> (i32, i32, i32) {
    %c1_i32 = arith.constant 1 : i32
    %0 = arith.addi %arg1, %c1_i32 : i32
    %c2_i32 = arith.constant 2 : i32
    %1 = arith.muli %0, %c2_i32 : i32
    %c0_i32 = arith.constant 0 : i32
    %c0_i32_0 = arith.constant 0 : i32
    return %arg0, %1, %c0_i32 : i32, i32, i32
  }
  func.func @transform_2(%arg0: i32, %arg1: i32, %arg2: i32) -> (i32, i32, i32) {
    %c0_i32 = arith.constant 0 : i32
    %c0_i32_0 = arith.constant 0 : i32
    %c0_i32_1 = arith.constant 0 : i32
    return %c0_i32, %c0_i32_0, %arg2 : i32, i32, i32
  }
  func.func @transform_3(%arg0: i32, %arg1: i32, %arg2: i32) -> (i32, i32) {
    %c0_i32 = arith.constant 0 : i32
    %c0_i32_0 = arith.constant 0 : i32
    return %c0_i32, %arg2 : i32, i32
  }
  func.func @transform_4(%arg0: i32, %arg1: i32, %arg2: i32) -> (i32, i32) {
    %c0_i32 = arith.constant 0 : i32
    %c0_i32_0 = arith.constant 0 : i32
    return %c0_i32, %arg2 : i32, i32
  }
  func.func @transform_5(%arg0: i32, %arg1: i32, %arg2: i32) -> (i32, i32, i32) {
    %c0_i32 = arith.constant 0 : i32
    return %arg0, %arg1, %arg2 : i32, i32, i32
  }
}

</mosaic_0001>

<bundles_post_ra>
// kernel: tpu_custom_call.1
= control target key start
LH: loop header
LB: loop body
LE: loop exit
PB: predicated region body
PF: predicated region fallthrough
CT: control target
= control target key end

     0   :  { %s5221_s18 = smov 0   ;;  %s5223_s19 = smov 0   ;;  %s6494_s0 = inlined_call_operand.vmem [shape: bf16[2,576,12], index: 0, kind: input, shape index: {}]   ;;  %s6495_s1 = inlined_call_operand.vmem [shape: bf16[2,576,12], index: 1, kind: input, shape index: {}]   ;;  %s6496_s2 = inlined_call_operand.vmem [shape: bf16[16,12,64], index: 2, kind: input, shape index: {}]   ;;  %s6497_s3 = inlined_call_operand.vmem [shape: f32[1,64], index: 3, kind: input, shape index: {}]   ;;  %s6498_s4 = inlined_call_operand.vmem [shape: f32[1,64], index: 4, kind: input, shape index: {}]   ;;  %s6499_s5 = inlined_call_operand.vmem [shape: bf16[2,432,64], index: 5, kind: output, shape index: {}]  }
   0x1   :  { %s5225_s20 = smov 0   ;;  %s5227_s21 = smov 0  }
   0x2   :  { %s5229_s22 = smov 0  }
   0x3 LB: > { %s30_s23 = sadd.s32 1, %s5179_s20  ;;  %s34_s24 = sadd.s32 1, %s5183_s21  ;;  %s5187_s22 = sphi %s5229_s22, %s15_s22   ;;  %s5183_s21 = sphi %s5227_s21, %s6503_s21   ;;  %s5179_s20 = sphi %s5225_s20, %s6502_s20   ;;  %s5175_s19 = sphi %s5223_s19, %s6501_s19   ;;  %s5171_s18 = sphi %s5221_s18, %s6500_s18  }
   0x4   : > { %p32_p0 = scmp.ge.s32.totalorder %s30_s23, 3  ;;  %p3529_p1 = scmp.ge.s32.totalorder %s5187_s22, 1 }
   0x5   : > { %p267_p2 = scmp.lt.s32.totalorder %s5187_s22, 7 }
   0x6   : > { %s6505_s23 = smov (%p32_p0, %s30_s23), 0  ;;  %s6507_s24 = smov (!%p32_p0, %s34_s24), %s5183_s21 }
   0x7   : > { %p268_p3 = pnand %p3529_p1, %p267_p2  ;;  %p36_p4 = scmp.ge.s32.totalorder %s6507_s24, 2 }
   0x8   : > { %vm532_vm0 = vcmask (!%p268_p3), 1045504   ;;  %v5189_v0 = vmov (!%p268_p3), 0.0   ;;  %v5119_v1 = vld [vmem:[%s6496_s2 + $0x20] sm:$0x3f] (!%p268_p3)   ;;  %v5120_v2 = vld [vmem:[%s6496_s2 + $0x10] sm:$0x3f] (!%p268_p3)  }
   0x9   : > { %s6509_s24 = smov (%p36_p4, %s6507_s24), 0  ;;  %271 = sbr.rel (%p268_p3) target bundleno = 820 (0x334), region = 40 }
   0xa   : > { %3945 = vmatprep.subr.bf16.mxu1 (!%p268_p3), %v5189_v0  ;;  %4249 = vmatprep.subr.bf16.mxu0 (!%p268_p3), %v5189_v0  ;;  %s5262_s29 = smul.u32 (!%p268_p3), 18, %s5171_s18  ;;  %p328_p5 = scmp.lt.s32.totalorder (!%p268_p3), %s5175_s19, 1  ;;  %v534_v3 = vsel (!%p268_p3), %vm532_vm0, %v5119_v1, 0  ;;  %vm5190_vm1 = vmmov (!%p268_p3), 0   ;;  %v1885_v4 = vsel (!%p268_p3), %vm532_vm0, %v5120_v2, 0  ;;  %vm470_vm2 = vcmask (!%p268_p3), 1043456  }
   0xb   : > { %3947 = vmatprep.mubr.msk.bf16.mxu1 (!%p268_p3), %vm5190_vm1, %v5189_v0  ;;  %4251 = vmatprep.mubr.msk.bf16.mxu0 (!%p268_p3), %vm5190_vm1, %v5189_v0  ;;  %s337_s30 = sadd.s32 (!%p268_p3), 1, %s5171_s18  ;;  %v5123_v5 = vld [vmem:[%s6496_s2] sm:$0x3f] (!%p268_p3)   ;;  %v5125_v6 = vld [vmem:[%s6496_s2 + $0x30] sm:$0x3f] (!%p268_p3)   ;;  %vm504_vm3 = vcmask (!%p268_p3), 97280  }
   0xc   : > { %3946 = vmatpush3.bf16.msra.mxu1 (!%p268_p3), %v534_v3  ;;  %4250 = vmatpush3.bf16.msra.mxu0 (!%p268_p3), %v1885_v4  ;;  %p330_p6 = scmp.lt.s32.totalorder (!%p268_p3), %s5262_s29, 71  ;;  %s3532_s8 = smul.u32 (!%p268_p3), 18, %s337_s30  ;;  %vm1832_vm4 = vcmask (!%p268_p3), 1046528   ;;  %v674_v14 = vsel (!%p268_p3), %vm532_vm0, %v5123_v5, 0  ;;  %v2066_v17 = vsel (!%p268_p3), %vm532_vm0, %v5125_v6, 0  ;;  %vm2013_vm5 = vcmask (!%p268_p3), 1042432  }
   0xd   : > { %3983 = vmatprep.subr.bf16.mxu1 (!%p268_p3), %v5189_v0  ;;  %4287 = vmatprep.subr.bf16.mxu0 (!%p268_p3), %v5189_v0  ;;  %v5134_v58 = vld [vmem:[%s6496_s2 + $0x40] sm:$0x3f] (!%p268_p3)   ;;  %v5135_v61 = vld [vmem:[%s6496_s2 + $0x50] sm:$0x3f] (!%p268_p3)   ;;  %vm1305_vm6 = vsmask.f32 (!%p268_p3), 3328 }
   0xe   : > { %p342_p7 = scmp.lt.s32.totalorder (!%p268_p3), %s3532_s8, 71  ;;  %v799_v62 = vsel (!%p268_p3), %vm532_vm0, %v5134_v58, 0  ;;  %v2215_v1 = vsel (!%p268_p3), %vm532_vm0, %v5135_v61, 0  ;;  %vm2693_vm7 = vsmask.f32 (!%p268_p3), 2304  ;;  %p364_p8 = scmp.lt.s32.totalorder (!%p268_p3), %s5262_s29, 53 }
   0xf   : > { %vm1077_vm8 = vsmask.f32 (!%p268_p3), 7424  ;;  %vm2492_vm9 = vsmask.f32 (!%p268_p3), 6400  ;;  %vm3341_vm10 = vcmask (!%p268_p3), 519168  }
  0x10   : > { %s6511_s19 = smov (!%p328_p5, %s5175_s19), 1  ;;  %s6513_s8 = smov (!%p342_p7, %s3532_s8), 71 }
  0x11   : > { %s5075_s6 = smul.u32 72, %s6511_s19 }
  0x12   : > { %s331_s7 = scalar_select %p330_p6, %s5262_s29, 71 }
  0x13   : > { %s345_s18 = sadd.s32 %s5075_s6, %s6513_s8  ;;  %s5076_s11 = smul.u32 54, %s6511_s19 }
  0x14   : > { %s333_s9 = sadd.s32 %s5075_s6, %s331_s7  ;;  %s3533_s25 = sshll.u32 %s345_s18, 2 }
  0x15   : > { %s3530_s10 = sshll.u32 %s333_s9, 2  ;;  %s5330_s28 = scalar_lea.vmem %s6495_s1, %s3533_s25 }
  0x16   : > { %s5286_s15 = scalar_lea.vmem %s6494_s0, %s3530_s10  ;;  %v5415_v47 = vld [vmem:[%s5330_s28] sm:$0xff]   ;;  %v5434_v52 = vld [vmem:[%s5330_s28 + $0x8] sm:$0xff]   ;;  %s6515_s29 = smov (!%p364_p8, %s5262_s29), 53 }
  0x17   : > { %v5292_v7 = vld [vmem:[%s5286_s15 + $0x8] sm:$0xff]   ;;  %v5295_v8 = vld [vmem:[%s5286_s15 + $0x10] sm:$0xff]   ;;  %v5298_v9 = vld [vmem:[%s5286_s15] sm:$0xff]   ;;  %v495_v49 = vrot.slane %v5415_v47, 4  ;;  %v497_v54 = vrot.slane %v5434_v52, 4  ;;  %v1850_v55 = vrot.slane %v5415_v47, 1  ;;  %s370_s14 = sadd.s32 %s5076_s11, %s6515_s29 }
  0x18   : > { %v480_v10 = vrot.slane %v5292_v7, 4  ;;  %v481_v11 = vrot.slane %v5295_v8, 4  ;;  %v1834_v12 = vrot.slane %v5292_v7, 1  ;;  %v5304_v13 = vld [vmem:[%s5286_s15 + $0x18] sm:$0xff]   ;;  %v1833_v15 = vrot.slane %v5298_v9, 1  ;;  %v5325_v22 = vld [vmem:[%s5286_s15 + $0x20] sm:$0xff]  }
  0x19   : > { %v483_v19 = vrot.slane %v5304_v13, 4  ;;  %v1836_v20 = vrot.slane %v5295_v8, 1  ;;  %v485_v24 = vrot.slane %v5325_v22, 4  ;;  %v1838_v25 = vrot.slane %v5304_v13, 1  ;;  %v5342_v26 = vld [vmem:[%s5286_s15 + $0x28] sm:$0xff]   ;;  %v5358_v32 = vld [vmem:[%s5286_s15 + $0x30] sm:$0xff]  }
  0x1a   : > { %v482_v16 = vsel %vm470_vm2, %v480_v10, %v481_v11  ;;  %v1835_v18 = vsel %vm1832_vm4, %v1833_v15, %v1834_v12  ;;  %v487_v29 = vrot.slane %v5342_v26, 4  ;;  %v1840_v30 = vrot.slane %v5325_v22, 1  ;;  %v5377_v37 = vld [vmem:[%s5286_s15 + $0x38] sm:$0xff]   ;;  %v5396_v42 = vld [vmem:[%s5286_s15 + $0x40] sm:$0xff]   ;;  %s3534_s19 = sshll.u32 %s370_s14, 2 }
  0x1b   : > { %3948 = vmatmul.mubr.msk.bf16.vlgmr.msra.gmra.mrb[0].mxu1 %vm504_vm3, %v482_v16  ;;  %4252 = vmatmul.mubr.msk.bf16.vlgmr.msra.gmra.mrb[0].mxu0 %vm504_vm3, %v1835_v18  ;;  %v484_v21 = vsel %vm470_vm2, %v481_v11, %v483_v19  ;;  %v1837_v23 = vsel %vm1832_vm4, %v1834_v12, %v1836_v20  ;;  %v486_v27 = vsel %vm470_vm2, %v483_v19, %v485_v24  ;;  %v489_v34 = vrot.slane %v5358_v32, 4  ;;  %s6409_s18 = scalar_lea.vmem %s6499_s5, %s3534_s19 }
  0x1c   : > { %3984 = vmatpush3.bf16.msra.mxu1 %v674_v14  ;;  %4288 = vmatpush3.bf16.msra.mxu0 %v2066_v17  ;;  %v1839_v28 = vsel %vm1832_vm4, %v1836_v20, %v1838_v25  ;;  %v5355_v31 = vsel %vm470_vm2, %v485_v24, %v487_v29  ;;  %v5361_v33 = vsel %vm1832_vm4, %v1838_v25, %v1840_v30  ;;  %v1842_v35 = vrot.slane %v5342_v26, 1  ;;  %v5137_v24 = vld [vmem:[%s6496_s2 + $0x70] sm:$0x3f]  }
  0x1d   : > { %3951 = vmatprep.mubr.msk.bf16.mxu1 %vm5190_vm1, %v5189_v0  ;;  %4255 = vmatprep.mubr.msk.bf16.mxu0 %vm5190_vm1, %v5189_v0  ;;  %v5374_v36 = vsel %vm470_vm2, %v487_v29, %v489_v34  ;;  %v491_v39 = vrot.slane %v5377_v37, 4  ;;  %v1844_v40 = vrot.slane %v5358_v32, 1  ;;  %v493_v44 = vrot.slane %v5396_v42, 4 }
  0x1e   : > { %4021 = vmatprep.subr.bf16.mxu1 %v5189_v0  ;;  %4325 = vmatprep.subr.bf16.mxu0 %v5189_v0  ;;  %v5380_v38 = vsel %vm1832_vm4, %v1840_v30, %v1842_v35  ;;  %v1846_v45 = vrot.slane %v5377_v37, 1  ;;  %v1848_v50 = vrot.slane %v5396_v42, 1  ;;  %v5452_v56 = vsel %vm470_vm2, %v495_v49, %v497_v54  ;;  %v5642_v30 = vld [vmem:[%s5330_s28 + $0x10] sm:$0xff]  }
  0x1f   : > { %v5393_v41 = vsel %vm470_vm2, %v489_v34, %v491_v39  ;;  %v5399_v43 = vsel %vm1832_vm4, %v1842_v35, %v1844_v40  ;;  %v5412_v46 = vsel %vm470_vm2, %v491_v39, %v493_v44  ;;  %v5431_v51 = vsel %vm470_vm2, %v493_v44, %v495_v49  ;;  %v5654_v35 = vld [vmem:[%s5330_s28 + $0x18] sm:$0xff]  }
  0x20   : > { %v5418_v48 = vsel %vm1832_vm4, %v1844_v40, %v1846_v45  ;;  %v5437_v53 = vsel %vm1832_vm4, %v1846_v45, %v1848_v50  ;;  %v5457_v57 = vsel %vm1832_vm4, %v1848_v50, %v1850_v55  ;;  %v2014_v59 = vrot.slane %v5292_v7, 5  ;;  %v5140_v40 = vld [vmem:[%s6496_s2 + $0x8] sm:$0x3f]  }
  0x21   : > { %v2015_v60 = vrot.slane %v5295_v8, 5  ;;  %v2017_v2 = vrot.slane %v5304_v13, 5  ;;  %v2019_v4 = vrot.slane %v5325_v22, 5  ;;  %v2021_v6 = vrot.slane %v5342_v26, 5 }
  0x22   : > { %v2023_v11 = vrot.slane %v5358_v32, 5  ;;  %v2025_v14 = vrot.slane %v5377_v37, 5  ;;  %v2027_v16 = vrot.slane %v5396_v42, 5  ;;  %v2029_v18 = vrot.slane %v5415_v47, 5 }
  0x23   : > { %3952 = vmatmul.mubr.msk.bf16.gmra.mrb[4].mxu1 %vm504_vm3, %v484_v21  ;;  %4256 = vmatmul.mubr.msk.bf16.gmra.mrb[4].mxu0 %vm504_vm3, %v1837_v23  ;;  %v2016_v63 = vsel %vm2013_vm5, %v2014_v59, %v2015_v60  ;;  %v2018_v3 = vsel %vm2013_vm5, %v2015_v60, %v2017_v2  ;;  %v2020_v5 = vsel %vm2013_vm5, %v2017_v2, %v2019_v4  ;;  %v2031_v20 = vrot.slane %v5434_v52, 5  ;;  %v5136_v23 = vld [vmem:[%s6496_s2 + $0x60] sm:$0x3f]  }
  0x24   : > { %3955 = vmatprep.mubr.msk.bf16.mxu1 %vm5190_vm1, %v5189_v0  ;;  %4259 = vmatprep.mubr.msk.bf16.mxu0 %vm5190_vm1, %v5189_v0  ;;  %v5507_v10 = vsel %vm2013_vm5, %v2019_v4, %v2021_v6  ;;  %v5519_v12 = vsel %vm2013_vm5, %v2021_v6, %v2023_v11  ;;  %v5531_v15 = vsel %vm2013_vm5, %v2023_v11, %v2025_v14  ;;  %v949_v25 = vsel %vm532_vm0, %v5136_v23, 0 }
  0x25   : > { %v5543_v17 = vsel %vm2013_vm5, %v2025_v14, %v2027_v16  ;;  %v5555_v19 = vsel %vm2013_vm5, %v2027_v16, %v2029_v18  ;;  %v5569_v21 = vsel %vm2013_vm5, %v2029_v18, %v2031_v20  ;;  %v1177_v44 = vsel %vm532_vm0, %v5140_v40, 0 }
  0x26   : > { %v5722_v58 = vshrl.u32 %v5304_v13, 16  ;;  %v5740_v2 = vshrl.u32 %v5325_v22, 16  ;;  %v5765_v14 = vshrl.u32 %v5342_v26, 16 }
  0x28   : > { %v1313_v59 = vrot.slane %v5722_v58, 4 }
  0x2b   : > { %3956 = vmatmul.mubr.msk.bf16.gmra.mrb[8].mxu1 %vm504_vm3, %v486_v27  ;;  %4260 = vmatmul.mubr.msk.bf16.gmra.mrb[8].mxu0 %vm504_vm3, %v1839_v28  ;;  %v2364_v27 = vsel %vm532_vm0, %v5137_v24, 0  ;;  %v2194_v28 = vrot.slane %v5434_v52, 1 }
  0x2c   : > { %3959 = vmatprep.mubr.msk.bf16.mxu1 %vm5190_vm1, %v5189_v0  ;;  %4263 = vmatprep.mubr.msk.bf16.mxu0 %vm5190_vm1, %v5189_v0 }
  0x2d   : > { %v2195_v29 = vsel %vm1832_vm4, %v1850_v55, %v2194_v28 }
  0x33   : > { %3960 = vmatmul.mubr.msk.bf16.gmra.mrb[12].mxu1 %vm504_vm3, %v5355_v31  ;;  %4264 = vmatmul.mubr.msk.bf16.gmra.mrb[12].mxu0 %vm504_vm3, %v5361_v33 }
  0x34   : > { %3963 = vmatprep.mubr.msk.bf16.mxu1 %vm5190_vm1, %v5189_v0  ;;  %4267 = vmatprep.mubr.msk.bf16.mxu0 %vm5190_vm1, %v5189_v0 }
  0x3b   : > { %3964 = vmatmul.mubr.msk.bf16.gmra.mrb[16].mxu1 %vm504_vm3, %v5374_v36  ;;  %4268 = vmatmul.mubr.msk.bf16.gmra.mrb[16].mxu0 %vm504_vm3, %v5380_v38 }
  0x3c   : > { %3967 = vmatprep.mubr.msk.bf16.mxu1 %vm5190_vm1, %v5189_v0  ;;  %4271 = vmatprep.mubr.msk.bf16.mxu0 %vm5190_vm1, %v5189_v0 }
  0x43   : > { %3968 = vmatmul.mubr.msk.bf16.gmra.mrb[20].mxu1 %vm504_vm3, %v5393_v41  ;;  %4272 = vmatmul.mubr.msk.bf16.gmra.mrb[20].mxu0 %vm504_vm3, %v5399_v43 }
  0x44   : > { %3971 = vmatprep.mubr.msk.bf16.mxu1 %vm5190_vm1, %v5189_v0  ;;  %4275 = vmatprep.mubr.msk.bf16.mxu0 %vm5190_vm1, %v5189_v0 }
  0x4b   : > { %3972 = vmatmul.mubr.msk.bf16.gmra.mrb[24].mxu1 %vm504_vm3, %v5412_v46  ;;  %4276 = vmatmul.mubr.msk.bf16.gmra.mrb[24].mxu0 %vm504_vm3, %v5418_v48 }
  0x4c   : > { %3975 = vmatprep.mubr.msk.bf16.mxu1 %vm5190_vm1, %v5189_v0  ;;  %4279 = vmatprep.mubr.msk.bf16.mxu0 %vm5190_vm1, %v5189_v0 }
  0x53   : > { %3976 = vmatmul.mubr.msk.bf16.gmra.mrb[28].mxu1 %vm504_vm3, %v5431_v51  ;;  %4280 = vmatmul.mubr.msk.bf16.gmra.mrb[28].mxu0 %vm504_vm3, %v5437_v53 }
  0x54   : > { %3979 = vmatprep.mubr.msk.bf16.mxu1 %vm5190_vm1, %v5189_v0  ;;  %4283 = vmatprep.mubr.msk.bf16.mxu0 %vm5190_vm1, %v5189_v0 }
  0x5b   : > { %3980 = vmatmul.mubr.msk.bf16.gmra.mrb[32].mxu1 %vm504_vm3, %v5452_v56  ;;  %4284 = vmatmul.mubr.msk.bf16.gmra.mrb[32].mxu0 %vm504_vm3, %v5457_v57 }
  0x5c   : > { %3985 = vmatprep.mubr.msk.bf16.mxu1 %vm5190_vm1, %v5189_v0  ;;  %4289 = vmatprep.mubr.msk.bf16.mxu0 %vm5190_vm1, %v5189_v0 }
  0x63   : > { %3986 = vmatmul.mubr.msk.bf16.vlgmr.msra.gmra.mrb[0].mxu1 %vm504_vm3, %v5298_v9  ;;  %4290 = vmatmul.mubr.msk.bf16.vlgmr.msra.gmra.mrb[0].mxu0 %vm504_vm3, %v2016_v63 }
  0x64   : > { %4022 = vmatpush3.bf16.msra.mxu1 %v799_v62  ;;  %4326 = vmatpush3.bf16.msra.mxu0 %v2215_v1 }
  0x65   : > { %3989 = vmatprep.mubr.msk.bf16.mxu1 %vm5190_vm1, %v5189_v0  ;;  %4293 = vmatprep.mubr.msk.bf16.mxu0 %vm5190_vm1, %v5189_v0 }
  0x66   : > { %4059 = vmatprep.subr.bf16.mxu1 %v5189_v0  ;;  %4363 = vmatprep.subr.bf16.mxu0 %v5189_v0 }
  0x6b   : > { %3990 = vmatmul.mubr.msk.bf16.gmra.mrb[4].mxu1 %vm504_vm3, %v5292_v7  ;;  %4294 = vmatmul.mubr.msk.bf16.gmra.mrb[4].mxu0 %vm504_vm3, %v2018_v3 }
  0x6c   : > { %3993 = vmatprep.mubr.msk.bf16.mxu1 %vm5190_vm1, %v5189_v0  ;;  %4297 = vmatprep.mubr.msk.bf16.mxu0 %vm5190_vm1, %v5189_v0 }
  0x73   : > { %3994 = vmatmul.mubr.msk.bf16.gmra.mrb[8].mxu1 %vm504_vm3, %v5295_v8  ;;  %4298 = vmatmul.mubr.msk.bf16.gmra.mrb[8].mxu0 %vm504_vm3, %v2020_v5 }
  0x74   : > { %3997 = vmatprep.mubr.msk.bf16.mxu1 %vm5190_vm1, %v5189_v0  ;;  %4301 = vmatprep.mubr.msk.bf16.mxu0 %vm5190_vm1, %v5189_v0 }
  0x7b   : > { %3998 = vmatmul.mubr.msk.bf16.gmra.mrb[12].mxu1 %vm504_vm3, %v5304_v13  ;;  %4302 = vmatmul.mubr.msk.bf16.gmra.mrb[12].mxu0 %vm504_vm3, %v5507_v10 }
  0x7c   : > { %4001 = vmatprep.mubr.msk.bf16.mxu1 %vm5190_vm1, %v5189_v0  ;;  %4305 = vmatprep.mubr.msk.bf16.mxu0 %vm5190_vm1, %v5189_v0 }
  0x83   : > { %4002 = vmatmul.mubr.msk.bf16.gmra.mrb[16].mxu1 %vm504_vm3, %v5325_v22  ;;  %4306 = vmatmul.mubr.msk.bf16.gmra.mrb[16].mxu0 %vm504_vm3, %v5519_v12 }
  0x84   : > { %4005 = vmatprep.mubr.msk.bf16.mxu1 %vm5190_vm1, %v5189_v0  ;;  %4309 = vmatprep.mubr.msk.bf16.mxu0 %vm5190_vm1, %v5189_v0 }
  0x8b   : > { %4006 = vmatmul.mubr.msk.bf16.gmra.mrb[20].mxu1 %vm504_vm3, %v5342_v26  ;;  %4310 = vmatmul.mubr.msk.bf16.gmra.mrb[20].mxu0 %vm504_vm3, %v5531_v15 }
  0x8c   : > { %4009 = vmatprep.mubr.msk.bf16.mxu1 %vm5190_vm1, %v5189_v0  ;;  %4313 = vmatprep.mubr.msk.bf16.mxu0 %vm5190_vm1, %v5189_v0 }
  0x93   : > { %4010 = vmatmul.mubr.msk.bf16.gmra.mrb[24].mxu1 %vm504_vm3, %v5358_v32  ;;  %4314 = vmatmul.mubr.msk.bf16.gmra.mrb[24].mxu0 %vm504_vm3, %v5543_v17 }
  0x94   : > { %4013 = vmatprep.mubr.msk.bf16.mxu1 %vm5190_vm1, %v5189_v0  ;;  %4317 = vmatprep.mubr.msk.bf16.mxu0 %vm5190_vm1, %v5189_v0 }
  0x9b   : > { %4014 = vmatmul.mubr.msk.bf16.gmra.mrb[28].mxu1 %vm504_vm3, %v5377_v37  ;;  %4318 = vmatmul.mubr.msk.bf16.gmra.mrb[28].mxu0 %vm504_vm3, %v5555_v19 }
  0x9c   : > { %4017 = vmatprep.mubr.msk.bf16.mxu1 %vm5190_vm1, %v5189_v0  ;;  %4321 = vmatprep.mubr.msk.bf16.mxu0 %vm5190_vm1, %v5189_v0 }
  0xa3   : > { %4018 = vmatmul.mubr.msk.bf16.gmra.mrb[32].mxu1 %vm504_vm3, %v5396_v42  ;;  %4322 = vmatmul.mubr.msk.bf16.gmra.mrb[32].mxu0 %vm504_vm3, %v5569_v21 }
  0xa4   : > { %4023 = vmatprep.mubr.msk.bf16.mxu1 %vm5190_vm1, %v5189_v0  ;;  %4327 = vmatprep.mubr.msk.bf16.mxu0 %vm5190_vm1, %v5189_v0 }
  0xab   : > { %4024 = vmatmul.mubr.msk.bf16.vlgmr.msra.gmra.mrb[0].mxu1 %vm504_vm3, %v5304_v13  ;;  %4328 = vmatmul.mubr.msk.bf16.vlgmr.msra.gmra.mrb[0].mxu0 %vm504_vm3, %v5361_v33  ;;  %v2196_v33 = vrot.slane %v5642_v30, 1 }
  0xac   : > { %4060 = vmatpush3.bf16.msra.mxu1 %v949_v25  ;;  %4364 = vmatpush3.bf16.msra.mxu0 %v2364_v27  ;;  %v5789_v25 = vshrl.u32 %v5358_v32, 16 }
  0xad   : > { %4027 = vmatprep.mubr.msk.bf16.mxu1 %vm5190_vm1, %v5189_v0  ;;  %4331 = vmatprep.mubr.msk.bf16.mxu0 %vm5190_vm1, %v5189_v0  ;;  %v2197_v34 = vsel %vm1832_vm4, %v2194_v28, %v2196_v33  ;;  %v928_v28 = vrot.slane %v5642_v30, 4 }
  0xae   : > { %4097 = vmatprep.subr.bf16.mxu1 %v5189_v0  ;;  %4401 = vmatprep.subr.bf16.mxu0 %v5189_v0 }
  0xb3   : > { %4028 = vmatmul.mubr.msk.bf16.gmra.mrb[4].mxu1 %vm504_vm3, %v5325_v22  ;;  %4332 = vmatmul.mubr.msk.bf16.gmra.mrb[4].mxu0 %vm504_vm3, %v5380_v38  ;;  %v2198_v38 = vrot.slane %v5654_v35, 1 }
  0xb4   : > { %4031 = vmatprep.mubr.msk.bf16.mxu1 %vm5190_vm1, %v5189_v0  ;;  %4335 = vmatprep.mubr.msk.bf16.mxu0 %vm5190_vm1, %v5189_v0 }
  0xb5   : > { %v2199_v39 = vsel %vm1832_vm4, %v2196_v33, %v2198_v38 }
  0xbb   : > { %4032 = vmatmul.mubr.msk.bf16.gmra.mrb[8].mxu1 %vm504_vm3, %v5342_v26  ;;  %4336 = vmatmul.mubr.msk.bf16.gmra.mrb[8].mxu0 %vm504_vm3, %v5399_v43  ;;  %v5141_v43 = vld [vmem:[%s6496_s2 + $0x18] sm:$0x3f]  }
  0xbc   : > { %4035 = vmatprep.mubr.msk.bf16.mxu1 %vm5190_vm1, %v5189_v0  ;;  %4339 = vmatprep.mubr.msk.bf16.mxu0 %vm5190_vm1, %v5189_v0  ;;  %v2565_v45 = vsel %vm532_vm0, %v5141_v43, 0 }
  0xc3   : > { %4036 = vmatmul.mubr.msk.bf16.gmra.mrb[12].mxu1 %vm504_vm3, %v5358_v32  ;;  %4340 = vmatmul.mubr.msk.bf16.gmra.mrb[12].mxu0 %vm504_vm3, %v5418_v48  ;;  %v5700_v48 = vshll.u32 %v5295_v8, 16 }
  0xc4   : > { %4039 = vmatprep.mubr.msk.bf16.mxu1 %vm5190_vm1, %v5189_v0  ;;  %4343 = vmatprep.mubr.msk.bf16.mxu0 %vm5190_vm1, %v5189_v0 }
  0xc5   : > { %v1310_v50 = vrot.slane %v5700_v48, 5  ;;  %v2698_v55 = vrot.slane %v5700_v48, 6 }
  0xcb   : > { %4040 = vmatmul.mubr.msk.bf16.gmra.mrb[16].mxu1 %vm504_vm3, %v5377_v37  ;;  %4344 = vmatmul.mubr.msk.bf16.gmra.mrb[16].mxu0 %vm504_vm3, %v5437_v53 }
  0xcc   : > { %4043 = vmatprep.mubr.msk.bf16.mxu1 %vm5190_vm1, %v5189_v0  ;;  %4347 = vmatprep.mubr.msk.bf16.mxu0 %vm5190_vm1, %v5189_v0 }
  0xd3   : > { %4044 = vmatmul.mubr.msk.bf16.gmra.mrb[20].mxu1 %vm504_vm3, %v5396_v42  ;;  %4348 = vmatmul.mubr.msk.bf16.gmra.mrb[20].mxu0 %vm504_vm3, %v5457_v57 }
  0xd4   : > { %4047 = vmatprep.mubr.msk.bf16.mxu1 %vm5190_vm1, %v5189_v0  ;;  %4351 = vmatprep.mubr.msk.bf16.mxu0 %vm5190_vm1, %v5189_v0 }
  0xdb   : > { %4048 = vmatmul.mubr.msk.bf16.gmra.mrb[24].mxu1 %vm504_vm3, %v5415_v47  ;;  %4352 = vmatmul.mubr.msk.bf16.gmra.mrb[24].mxu0 %vm504_vm3, %v2195_v29 }
  0xdc   : > { %4051 = vmatprep.mubr.msk.bf16.mxu1 %vm5190_vm1, %v5189_v0  ;;  %4355 = vmatprep.mubr.msk.bf16.mxu0 %vm5190_vm1, %v5189_v0 }
  0xe3   : > { %4052 = vmatmul.mubr.msk.bf16.gmra.mrb[28].mxu1 %vm504_vm3, %v5434_v52  ;;  %4356 = vmatmul.mubr.msk.bf16.gmra.mrb[28].mxu0 %vm504_vm3, %v2197_v34  ;;  %v2713_v34 = vrot.slane %v5789_v25, 5 }
  0xe4   : > { %4055 = vmatprep.mubr.msk.bf16.mxu1 %vm5190_vm1, %v5189_v0  ;;  %4359 = vmatprep.mubr.msk.bf16.mxu0 %vm5190_vm1, %v5189_v0 }
  0xeb   : > { %4056 = vmatmul.mubr.msk.bf16.gmra.mrb[32].mxu1 %vm504_vm3, %v5642_v30  ;;  %4360 = vmatmul.mubr.msk.bf16.gmra.mrb[32].mxu0 %vm504_vm3, %v2199_v39 }
  0xec   : > { %4061 = vmatprep.mubr.msk.bf16.mxu1 %vm5190_vm1, %v5189_v0  ;;  %4365 = vmatprep.mubr.msk.bf16.mxu0 %vm5190_vm1, %v5189_v0 }
  0xf3   : > { %4062 = vmatmul.mubr.msk.bf16.vlgmr.msra.gmra.mrb[0].mxu1 %vm504_vm3, %v5355_v31  ;;  %4366 = vmatmul.mubr.msk.bf16.vlgmr.msra.gmra.mrb[0].mxu0 %vm504_vm3, %v5507_v10  ;;  %v5693_v31 = vshrl.u32 %v5295_v8, 16  ;;  %v5719_v8 = vshll.u32 %v5304_v13, 16  ;;  %v5737_v13 = vshll.u32 %v5325_v22, 16  ;;  %v2705_v22 = vrot.slane %v5740_v2, 5 }
  0xf4   : > { %4098 = vmatpush3.bf16.msra.mxu1 %v1177_v44  ;;  %4402 = vmatpush3.bf16.msra.mxu0 %v2565_v45  ;;  %v5142_v44 = vld [vmem:[%s5330_s28 + $0x20] ss:$0 sps:$4 sm:$0xff]   ;;  %v5818_v45 = vshll.u32 %v5377_v37, 16 }
  0xf5   : > { %4065 = vmatprep.mubr.msk.bf16.mxu1 %vm5190_vm1, %v5189_v0  ;;  %4369 = vmatprep.mubr.msk.bf16.mxu0 %vm5190_vm1, %v5189_v0  ;;  %v1309_v49 = vrot.slane %v5693_v31, 4  ;;  %v1314_v60 = vrot.slane %v5719_v8, 5  ;;  %v2702_v61 = vrot.slane %v5719_v8, 6  ;;  %v1318_v4 = vrot.slane %v5737_v13, 5 }
  0xf6   : > { %4135 = vmatprep.subr.bf16.mxu1 %v5189_v0  ;;  %4439 = vmatprep.subr.bf16.mxu0 %v5189_v0  ;;  %v2706_v6 = vrot.slane %v5737_v13, 6 }
  0xf7   : > { %v5707_v53 = vor.u32 %v1310_v50, %v1309_v49  ;;  %v1315_v62 = vor.u32 %v1314_v60, %v1313_v59  ;;  %v5821_v49 = vshrl.u32 %v5377_v37, 16  ;;  %v1330_v37 = vrot.slane %v5818_v45, 5 }
  0xf8   : > { %v2707_v11 = vor.u32 %v2706_v6, %v2705_v22  ;;  %v5849_v22 = vshll.u32 %v5396_v42, 16  ;;  %v5852_v6 = vshrl.u32 %v5396_v42, 16 }
  0xf9   : > { %v5732_v1 = vsel %vm1305_vm6, %v5707_v53, %v1315_v62  ;;  %v2717_v60 = vrot.slane %v5821_v49, 5 }
  0xfb   : > { %4066 = vmatmul.mubr.msk.bf16.gmra.mrb[4].mxu1 %vm504_vm3, %v5374_v36  ;;  %4370 = vmatmul.mubr.msk.bf16.gmra.mrb[4].mxu0 %vm504_vm3, %v5519_v12  ;;  %v2697_v36 = vrot.slane %v5693_v31, 5  ;;  %v5762_v12 = vshll.u32 %v5342_v26, 16  ;;  %v2709_v26 = vrot.slane %v5765_v14, 5 }
  0xfc   : > { %4069 = vmatprep.mubr.msk.bf16.mxu1 %vm5190_vm1, %v5189_v0  ;;  %4373 = vmatprep.mubr.msk.bf16.mxu0 %vm5190_vm1, %v5189_v0 }
  0xfd   : > { %v5710_v57 = vor.u32 %v2698_v55, %v2697_v36  ;;  %v1322_v16 = vrot.slane %v5762_v12, 5  ;;  %v2710_v18 = vrot.slane %v5762_v12, 6  ;;  %v1329_v36 = vrot.slane %v5821_v49, 4 }
  0xfe   : > { %v5836_v55 = vsel %vm470_vm2, %v5142_v44, 0  ;;  %v5886_v44 = vshrl.u32 %v5415_v47, 16 }
  0xff   : > { %v2711_v24 = vor.u32 %v2710_v18, %v2709_v26  ;;  %v1331_v59 = vor.u32 %v1330_v37, %v1329_v36  ;;  %v2347_v42 = vrot.slane %v5836_v55, 5  ;;  %v1333_v26 = vrot.slane %v5852_v6, 4  ;;  %v5143_v37 = vld [vmem:[%s6496_s2 + $0x28] sm:$0x3f]  }
 0x100   : > { %v1334_v18 = vrot.slane %v5849_v22, 5 }
 0x101   : > { %v5792_v27 = vsel %vm2693_vm7, %v2707_v11, %v2711_v24 }
 0x103   : > { %4070 = vmatmul.mubr.msk.bf16.gmra.mrb[8].mxu1 %vm504_vm3, %v5393_v41  ;;  %4374 = vmatmul.mubr.msk.bf16.gmra.mrb[8].mxu0 %vm504_vm3, %v5531_v15  ;;  %v2701_v41 = vrot.slane %v5722_v58, 5 }
 0x104   : > { %4073 = vmatprep.mubr.msk.bf16.mxu1 %vm5190_vm1, %v5189_v0  ;;  %4377 = vmatprep.mubr.msk.bf16.mxu0 %vm5190_vm1, %v5189_v0 }
 0x105   : > { %v2703_v63 = vor.u32 %v2702_v61, %v2701_v41  ;;  %v2718_v41 = vrot.slane %v5818_v45, 6 }
 0x107   : > { %v5744_v3 = vsel %vm2693_vm7, %v5710_v57, %v2703_v63  ;;  %v5768_v15 = vsel %vm2693_vm7, %v2703_v63, %v2707_v11 }
 0x10b   : > { %4074 = vmatmul.mubr.msk.bf16.gmra.mrb[12].mxu1 %vm504_vm3, %v5412_v46  ;;  %4378 = vmatmul.mubr.msk.bf16.gmra.mrb[12].mxu0 %vm504_vm3, %v5543_v17  ;;  %v1317_v46 = vrot.slane %v5740_v2, 4 }
 0x10c   : > { %4077 = vmatprep.mubr.msk.bf16.mxu1 %vm5190_vm1, %v5189_v0  ;;  %4381 = vmatprep.mubr.msk.bf16.mxu0 %vm5190_vm1, %v5189_v0 }
 0x10d   : > { %v1319_v5 = vor.u32 %v1318_v4, %v1317_v46  ;;  %v2719_v46 = vor.u32 %v2718_v41, %v2717_v60  ;;  %v932_v4 = vrot.slane %v5836_v55, 4 }
 0x10f   : > { %v5757_v10 = vsel %vm1305_vm6, %v1315_v62, %v1319_v5 }
 0x113   : > { %4078 = vmatmul.mubr.msk.bf16.gmra.mrb[16].mxu1 %vm504_vm3, %v5431_v51  ;;  %4382 = vmatmul.mubr.msk.bf16.gmra.mrb[16].mxu0 %vm504_vm3, %v5555_v19  ;;  %v1321_v51 = vrot.slane %v5765_v14, 4  ;;  %v5786_v19 = vshll.u32 %v5358_v32, 16  ;;  %v1325_v32 = vrot.slane %v5789_v25, 4 }
 0x114   : > { %4081 = vmatprep.mubr.msk.bf16.mxu1 %vm5190_vm1, %v5189_v0  ;;  %4385 = vmatprep.mubr.msk.bf16.mxu0 %vm5190_vm1, %v5189_v0 }
 0x115   : > { %v1323_v17 = vor.u32 %v1322_v16, %v1321_v51  ;;  %v1326_v29 = vrot.slane %v5786_v19, 5  ;;  %v2714_v38 = vrot.slane %v5786_v19, 6  ;;  %v1078_v51 = vshrl.u32 %v5298_v9, 16 }
 0x116   : > { %v5862_v16 = vshll.u32 %v5292_v7, 16 }
 0x117   : > { %v5781_v23 = vsel %vm1305_vm6, %v1319_v5, %v1323_v17  ;;  %v1327_v33 = vor.u32 %v1326_v29, %v1325_v32  ;;  %v2715_v43 = vor.u32 %v2714_v38, %v2713_v34  ;;  %v1080_v5 = vshll.u32 %v5298_v9, 16 }
 0x118   : > { %v2721_v9 = vrot.slane %v5852_v6, 5  ;;  %v2722_v32 = vrot.slane %v5849_v22, 6  ;;  %v2493_v29 = vrot.slane %v1078_v51, 1  ;;  %v2497_v34 = vrot.slane %v5862_v16, 2 }
 0x119   : > { %v5813_v40 = vsel %vm1305_vm6, %v1323_v17, %v1327_v33  ;;  %v5824_v50 = vsel %vm2693_vm7, %v2711_v24, %v2715_v43  ;;  %v5843_v63 = vsel %vm1305_vm6, %v1327_v33, %v1331_v59  ;;  %v5855_v11 = vsel %vm2693_vm7, %v2715_v43, %v2719_v46 }
 0x11a   : > { %v5865_v17 = vshrl.u32 %v5292_v7, 16  ;;  %v2494_v7 = vrot.slane %v1080_v5, 2  ;;  %v5883_v43 = vshll.u32 %v5415_v47, 16  ;;  %v1086_v36 = vrot.slane %v5862_v16, 1 }
 0x11b   : > { %4082 = vmatmul.mubr.msk.bf16.gmra.mrb[20].mxu1 %vm504_vm3, %v5452_v56  ;;  %4386 = vmatmul.mubr.msk.bf16.gmra.mrb[20].mxu0 %vm504_vm3, %v5569_v21  ;;  %v2343_v56 = vrot.slane %v5642_v30, 5  ;;  %v929_v21 = vsel %vm470_vm2, %v497_v54, %v928_v28  ;;  %v930_v54 = vrot.slane %v5654_v35, 4  ;;  %v1339_v47 = vrot.slane %v5886_v44, 4 }
 0x11c   : > { %4085 = vmatprep.mubr.msk.bf16.mxu1 %vm5190_vm1, %v5189_v0  ;;  %4389 = vmatprep.mubr.msk.bf16.mxu0 %vm5190_vm1, %v5189_v0  ;;  %v2496_v33 = vrot.slane %v5865_v17, 1  ;;  %v1340_v41 = vrot.slane %v5883_v43, 5 }
 0x11d   : > { %v2344_v39 = vsel %vm2013_vm5, %v2031_v20, %v2343_v56  ;;  %v2345_v20 = vrot.slane %v5654_v35, 5  ;;  %v931_v61 = vsel %vm470_vm2, %v928_v28, %v930_v54  ;;  %v933_v24 = vsel %vm470_vm2, %v930_v54, %v932_v4 }
 0x11e   : > { %v1082_v28 = vrot.slane %v1080_v5, 1  ;;  %v2498_v60 = vor.u32 %v2497_v34, %v2496_v33  ;;  %v2726_v4 = vrot.slane %v5883_v43, 6 }
 0x11f   : > { %v2346_v62 = vsel %vm2013_vm5, %v2343_v56, %v2345_v20  ;;  %v1335_v56 = vor.u32 %v1334_v18, %v1333_v26  ;;  %v2348_v38 = vsel %vm2013_vm5, %v2345_v20, %v2347_v42  ;;  %v2500_v26 = vrot.slane %v5693_v31, 1 }
 0x120   : > { %v1083_v20 = vor.u32 %v1082_v28, %v1078_v51  ;;  %v1384_v51 = vsel %vm532_vm0, %v5143_v37, 0  ;;  %v2501_v18 = vrot.slane %v5700_v48, 2 }
 0x122   : > { %v1087_v5 = vsel %vm1077_vm8, %v1083_v20, %v1086_v36  ;;  %v1100_v20 = vrot.slane %v5719_v8, 1 }
 0x123   : > { %4086 = vmatmul.mubr.msk.bf16.gmra.mrb[24].mxu1 %vm504_vm3, %v929_v21  ;;  %4390 = vmatmul.mubr.msk.bf16.gmra.mrb[24].mxu0 %vm504_vm3, %v2344_v39  ;;  %v5879_v21 = vsel %vm1305_vm6, %v1331_v59, %v1335_v56  ;;  %v2723_v39 = vor.u32 %v2722_v32, %v2721_v9  ;;  %v2495_v59 = vor.u32 %v2494_v7, %v2493_v29  ;;  %v1093_v7 = vrot.slane %v5700_v48, 1 }
 0x124   : > { %4089 = vmatprep.mubr.msk.bf16.mxu1 %vm5190_vm1, %v5189_v0  ;;  %4393 = vmatprep.mubr.msk.bf16.mxu0 %vm5190_vm1, %v5189_v0  ;;  %v1090_v29 = vor.u32 %v5865_v17, %v1086_v36  ;;  %v2505_v48 = vrot.slane %v5719_v8, 2  ;;  %v1107_v8 = vrot.slane %v5737_v13, 1 }
 0x125   : > { %v5889_v54 = vsel %vm2693_vm7, %v2719_v46, %v2723_v39  ;;  %v2725_v46 = vrot.slane %v5886_v44, 5  ;;  %v2499_v42 = vsel %vm2492_vm9, %v2495_v59, %v2498_v60 }
 0x126   : > { %v1094_v33 = vsel %vm1077_vm8, %v1090_v29, %v1093_v7 }
 0x127   : > { %v5918_v28 = vor.u32 %v2726_v4, %v2725_v46  ;;  %v2512_v4 = vrot.slane %v5765_v14, 1 }
 0x129   : > { %v5924_v32 = vsel %vm2693_vm7, %v2723_v39, %v5918_v28  ;;  %v1097_v39 = vor.u32 %v5693_v31, %v1093_v7  ;;  %v1104_v31 = vor.u32 %v5722_v58, %v1100_v20 }
 0x12b   : > { %4090 = vmatmul.mubr.msk.bf16.gmra.mrb[28].mxu1 %vm504_vm3, %v931_v61  ;;  %4394 = vmatmul.mubr.msk.bf16.gmra.mrb[28].mxu0 %vm504_vm3, %v2346_v62  ;;  %v5144_v61 = vld [vmem:[%s6496_s2 + $0x38] sm:$0x3f]   ;;  %v5905_v62 = vor.u32 %v1340_v41, %v1339_v47  ;;  %v1101_v37 = vsel %vm1077_vm8, %v1097_v39, %v1100_v20  ;;  %v2509_v47 = vrot.slane %v5737_v13, 2  ;;  %v1114_v13 = vrot.slane %v5762_v12, 1 }
 0x12c   : > { %4093 = vmatprep.mubr.msk.bf16.mxu1 %vm5190_vm1, %v5189_v0  ;;  %4397 = vmatprep.mubr.msk.bf16.mxu0 %vm5190_vm1, %v5189_v0  ;;  %v2766_v9 = vsel %vm532_vm0, %v5144_v61, 0  ;;  %v5960_v61 = vsel %vm1077_vm8, %v1104_v31, %v1107_v8  ;;  %v2524_v20 = vrot.slane %v5852_v6, 1  ;;  %v2529_v31 = vrot.slane %v5883_v43, 2 }
 0x133   : > { %4094 = vmatmul.mubr.msk.bf16.gmra.mrb[32].mxu1 %vm504_vm3, %v933_v24  ;;  %4398 = vmatmul.mubr.msk.bf16.gmra.mrb[32].mxu0 %vm504_vm3, %v2348_v38  ;;  %v5916_v24 = vsel %vm1305_vm6, %v1335_v56, %v5905_v62  ;;  %v2502_v56 = vor.u32 %v2501_v18, %v2500_v26  ;;  %v2504_v38 = vrot.slane %v5722_v58, 1  ;;  %v1111_v58 = vor.u32 %v5740_v2, %v1107_v8 }
 0x134   : > { %4099 = vmatprep.mubr.msk.bf16.mxu1 %vm5190_vm1, %v5189_v0  ;;  %4403 = vmatprep.mubr.msk.bf16.mxu0 %vm5190_vm1, %v5189_v0  ;;  %v2516_v18 = vrot.slane %v5789_v25, 1 }
 0x135   : > { %v2503_v34 = vsel %vm2492_vm9, %v2498_v60, %v2502_v56  ;;  %v2506_v36 = vor.u32 %v2505_v48, %v2504_v38  ;;  %v2508_v60 = vrot.slane %v5740_v2, 1  ;;  %v1118_v2 = vor.u32 %v5765_v14, %v1114_v13 }
 0x137   : > { %v2507_v59 = vsel %vm2492_vm9, %v2502_v56, %v2506_v36  ;;  %v2510_v41 = vor.u32 %v2509_v47, %v2508_v60  ;;  %v2528_v47 = vrot.slane %v5886_v44, 1 }
 0x139   : > { %v5963_v46 = vsel %vm2492_vm9, %v2506_v36, %v2510_v41  ;;  %v2525_v36 = vrot.slane %v5849_v22, 2  ;;  %v6049_v8 = vor.u32 %v2529_v31, %v2528_v47  ;;  %v6189_v47 = vshll.u32 %v5654_v35, 16 }
 0x13a   : > { %v6192_v31 = vshrl.u32 %v5654_v35, 16  ;;  %v5148_v35 = vld [vmem:[%s6496_s2 + $0x78] sm:$0x3f]  }
 0x13b   : > { %4100 = vmatmul.mubr.msk.bf16.vlgmr.msra.gmra.mrb[0].mxu1 %vm504_vm3, %v1087_v5  ;;  %4404 = vmatmul.mubr.msk.bf16.vlgmr.msra.gmra.mrb[0].mxu0 %vm504_vm3, %v2499_v42  ;;  %v2513_v5 = vrot.slane %v5762_v12, 2  ;;  %v5978_v42 = vsel %vm1077_vm8, %v1111_v58, %v1114_v13  ;;  %v1121_v12 = vrot.slane %v5786_v19, 1  ;;  %v2695_v13 = vrot.slane %v5862_v16, 6 }
 0x13c   : > { %4136 = vmatpush3.bf16.msra.mxu1 %v1384_v51  ;;  %4440 = vmatpush3.bf16.msra.mxu0 %v2766_v9  ;;  %v2517_v9 = vrot.slane %v5786_v19, 2  ;;  %v1128_v19 = vrot.slane %v5818_v45, 1 }
 0x13d   : > { %4103 = vmatprep.mubr.msk.bf16.mxu1 %vm5190_vm1, %v5189_v0  ;;  %4407 = vmatprep.mubr.msk.bf16.mxu0 %vm5190_vm1, %v5189_v0  ;;  %v2514_v51 = vor.u32 %v2513_v5, %v2512_v4  ;;  %v5996_v7 = vsel %vm1077_vm8, %v1118_v2, %v1121_v12  ;;  %v1125_v14 = vor.u32 %v5789_v25, %v1121_v12  ;;  %v1306_v4 = vrot.slane %v5865_v17, 4 }
 0x13e   : > { %4173 = vmatprep.subr.bf16.mxu1 %v5189_v0  ;;  %4477 = vmatprep.subr.bf16.mxu0 %v5189_v0  ;;  %v2518_v29 = vor.u32 %v2517_v9, %v2516_v18  ;;  %v1132_v25 = vor.u32 %v5821_v49, %v1128_v19  ;;  %v1307_v5 = vrot.slane %v5862_v16, 5  ;;  %v5145_v18 = vld [vmem:[%s6496_s2 + $0x48] sm:$0x3f]   ;;  %v5146_v16 = vld [vmem:[%s6496_s2 + $0x58] sm:$0x3f]  }
 0x13f   : > { %v5981_v26 = vsel %vm2492_vm9, %v2510_v41, %v2514_v51  ;;  %v6014_v48 = vsel %vm1077_vm8, %v1125_v14, %v1128_v19  ;;  %v1543_v2 = vsel %vm532_vm0, %v5145_v18, 0 }
 0x140   : > { %v5999_v56 = vsel %vm2492_vm9, %v2514_v51, %v2518_v29  ;;  %v1308_v51 = vor.u32 %v1307_v5, %v1306_v4  ;;  %v3053_v5 = vrot.slane %v6192_v31, 5 }
 0x142   : > { %v1312_v9 = vsel %vm1305_vm6, %v1308_v51, %v5707_v53  ;;  %v6139_v53 = vshrl.u32 %v5434_v52, 16 }
 0x143   : > { %4104 = vmatmul.mubr.msk.bf16.gmra.mrb[4].mxu1 %vm504_vm3, %v1094_v33  ;;  %4408 = vmatmul.mubr.msk.bf16.gmra.mrb[4].mxu0 %vm504_vm3, %v2503_v34  ;;  %v2520_v33 = vrot.slane %v5821_v49, 1  ;;  %v2521_v34 = vrot.slane %v5818_v45, 2  ;;  %v1135_v45 = vrot.slane %v5849_v22, 1  ;;  %v1142_v22 = vrot.slane %v5883_v43, 1 }
 0x144   : > { %4107 = vmatprep.mubr.msk.bf16.mxu1 %vm5190_vm1, %v5189_v0  ;;  %4411 = vmatprep.mubr.msk.bf16.mxu0 %vm5190_vm1, %v5189_v0 }
 0x145   : > { %v2522_v38 = vor.u32 %v2521_v34, %v2520_v33  ;;  %v1139_v49 = vor.u32 %v5852_v6, %v1135_v45  ;;  %v2694_v6 = vrot.slane %v5865_v17, 5  ;;  %v6153_v33 = vshll.u32 %v5642_v30, 16 }
 0x147   : > { %v6017_v39 = vsel %vm2492_vm9, %v2518_v29, %v2522_v38  ;;  %v6054_v41 = vsel %vm1077_vm8, %v1139_v49, %v1142_v22  ;;  %v2696_v17 = vor.u32 %v2695_v13, %v2694_v6  ;;  %v2921_v29 = vsel %vm532_vm0, %v5146_v16, 0 }
 0x148   : > { %v1678_v49 = vrot.slane %v6189_v47, 5  ;;  %v3054_v6 = vrot.slane %v6189_v47, 6 }
 0x149   : > { %v2700_v12 = vsel %vm2693_vm7, %v2696_v17, %v5710_v57  ;;  %v6142_v57 = vshll.u32 %v5434_v52, 16  ;;  %v6156_v52 = vshrl.u32 %v5642_v30, 16  ;;  %v3076_v17 = vsel %vm532_vm0, %v5148_v35, 0 }
 0x14a   : > { %v6218_v18 = vor.u32 %v3054_v6, %v3053_v5 }
 0x14b   : > { %4108 = vmatmul.mubr.msk.bf16.gmra.mrb[8].mxu1 %vm504_vm3, %v1101_v37  ;;  %4412 = vmatmul.mubr.msk.bf16.gmra.mrb[8].mxu0 %vm504_vm3, %v2507_v59  ;;  %v2526_v37 = vor.u32 %v2525_v36, %v2524_v20  ;;  %v6032_v59 = vsel %vm1077_vm8, %v1132_v25, %v1135_v45  ;;  %v1671_v19 = vrot.slane %v6156_v52, 4  ;;  %v3049_v30 = vrot.slane %v6156_v52, 5 }
 0x14c   : > { %4111 = vmatprep.mubr.msk.bf16.mxu1 %vm5190_vm1, %v5189_v0  ;;  %4415 = vmatprep.mubr.msk.bf16.mxu0 %vm5190_vm1, %v5189_v0  ;;  %v3050_v36 = vrot.slane %v6153_v33, 6 }
 0x14d   : > { %v6035_v60 = vsel %vm2492_vm9, %v2522_v38, %v2526_v37  ;;  %v6060_v58 = vsel %vm2492_vm9, %v2526_v37, %v6049_v8  ;;  %v1672_v38 = vrot.slane %v6153_v33, 5 }
 0x14e   : > { %v6184_v37 = vor.u32 %v3050_v36, %v3049_v30 }
 0x14f   : > { %v6170_v20 = vor.u32 %v1672_v38, %v1671_v19 }
 0x150   : > { %v6226_v16 = vsel %vm2693_vm7, %v6184_v37, %v6218_v18 }
 0x153   : > { %4112 = vmatmul.mubr.msk.bf16.gmra.mrb[12].mxu1 %vm504_vm3, %v5960_v61  ;;  %4416 = vmatmul.mubr.msk.bf16.gmra.mrb[12].mxu0 %vm504_vm3, %v5963_v46 }
 0x154   : > { %4115 = vmatprep.mubr.msk.bf16.mxu1 %vm5190_vm1, %v5189_v0  ;;  %4419 = vmatprep.mubr.msk.bf16.mxu0 %vm5190_vm1, %v5189_v0 }
 0x15b   : > { %4116 = vmatmul.mubr.msk.bf16.gmra.mrb[16].mxu1 %vm504_vm3, %v5978_v42  ;;  %4420 = vmatmul.mubr.msk.bf16.gmra.mrb[16].mxu0 %vm504_vm3, %v5981_v26 }
 0x15c   : > { %4119 = vmatprep.mubr.msk.bf16.mxu1 %vm5190_vm1, %v5189_v0  ;;  %4423 = vmatprep.mubr.msk.bf16.mxu0 %vm5190_vm1, %v5189_v0 }
 0x163   : > { %4120 = vmatmul.mubr.msk.bf16.gmra.mrb[20].mxu1 %vm504_vm3, %v5996_v7  ;;  %4424 = vmatmul.mubr.msk.bf16.gmra.mrb[20].mxu0 %vm504_vm3, %v5999_v56 }
 0x164   : > { %4123 = vmatprep.mubr.msk.bf16.mxu1 %vm5190_vm1, %v5189_v0  ;;  %4427 = vmatprep.mubr.msk.bf16.mxu0 %vm5190_vm1, %v5189_v0 }
 0x16b   : > { %4124 = vmatmul.mubr.msk.bf16.gmra.mrb[24].mxu1 %vm504_vm3, %v6014_v48  ;;  %4428 = vmatmul.mubr.msk.bf16.gmra.mrb[24].mxu0 %vm504_vm3, %v6017_v39 }
 0x16c   : > { %4127 = vmatprep.mubr.msk.bf16.mxu1 %vm5190_vm1, %v5189_v0  ;;  %4431 = vmatprep.mubr.msk.bf16.mxu0 %vm5190_vm1, %v5189_v0 }
 0x173   : > { %4128 = vmatmul.mubr.msk.bf16.gmra.mrb[28].mxu1 %vm504_vm3, %v6032_v59  ;;  %4432 = vmatmul.mubr.msk.bf16.gmra.mrb[28].mxu0 %vm504_vm3, %v6035_v60 }
 0x174   : > { %4131 = vmatprep.mubr.msk.bf16.mxu1 %vm5190_vm1, %v5189_v0  ;;  %4435 = vmatprep.mubr.msk.bf16.mxu0 %vm5190_vm1, %v5189_v0 }
 0x17b   : > { %4132 = vmatmul.mubr.msk.bf16.gmra.mrb[32].mxu1 %vm504_vm3, %v6054_v41  ;;  %4436 = vmatmul.mubr.msk.bf16.gmra.mrb[32].mxu0 %vm504_vm3, %v6060_v58 }
 0x17c   : > { %4137 = vmatprep.mubr.msk.bf16.mxu1 %vm5190_vm1, %v5189_v0  ;;  %4441 = vmatprep.mubr.msk.bf16.mxu0 %vm5190_vm1, %v5189_v0 }
 0x183   : > { %4138 = vmatmul.mubr.msk.bf16.vlgmr.msra.gmra.mrb[0].mxu1 %vm504_vm3, %v1312_v9  ;;  %4442 = vmatmul.mubr.msk.bf16.vlgmr.msra.gmra.mrb[0].mxu0 %vm504_vm3, %v2700_v12 }
 0x184   : > { %4174 = vmatpush3.bf16.msra.mxu1 %v1543_v2  ;;  %4478 = vmatpush3.bf16.msra.mxu0 %v2921_v29  ;;  %v1526_v2 = vrot.slane %v6189_v47, 1 }
 0x185   : > { %4141 = vmatprep.mubr.msk.bf16.mxu1 %vm5190_vm1, %v5189_v0  ;;  %4445 = vmatprep.mubr.msk.bf16.mxu0 %vm5190_vm1, %v5189_v0 }
 0x186   : > { %4211 = vmatprep.subr.bf16.mxu1 %v5189_v0  ;;  %4515 = vmatprep.subr.bf16.mxu0 %v5189_v0 }
 0x18b   : > { %4142 = vmatmul.mubr.msk.bf16.gmra.mrb[4].mxu1 %vm504_vm3, %v5732_v1  ;;  %4446 = vmatmul.mubr.msk.bf16.gmra.mrb[4].mxu0 %vm504_vm3, %v5744_v3  ;;  %v1345_v1 = vrot.slane %v6139_v53, 4  ;;  %v1348_v3 = vrot.slane %v6142_v57, 5 }
 0x18c   : > { %4145 = vmatprep.mubr.msk.bf16.mxu1 %vm5190_vm1, %v5189_v0  ;;  %4449 = vmatprep.mubr.msk.bf16.mxu0 %vm5190_vm1, %v5189_v0 }
 0x18d   : > { %v6162_v34 = vor.u32 %v1348_v3, %v1345_v1 }
 0x18f   : > { %v6177_v25 = vsel %vm1305_vm6, %v5905_v62, %v6162_v34  ;;  %v5147_v62 = vld [vmem:[%s6496_s2 + $0x68] sm:$0x3f]  }
 0x190   : > { %v1704_v13 = vsel %vm532_vm0, %v5147_v62, 0 }
 0x193   : > { %4146 = vmatmul.mubr.msk.bf16.gmra.mrb[8].mxu1 %vm504_vm3, %v5757_v10  ;;  %4450 = vmatmul.mubr.msk.bf16.gmra.mrb[8].mxu0 %vm504_vm3, %v5768_v15  ;;  %v2729_v10 = vrot.slane %v6139_v53, 5  ;;  %v2730_v15 = vrot.slane %v6142_v57, 6 }
 0x194   : > { %4149 = vmatprep.mubr.msk.bf16.mxu1 %vm5190_vm1, %v5189_v0  ;;  %4453 = vmatprep.mubr.msk.bf16.mxu0 %vm5190_vm1, %v5189_v0 }
 0x195   : > { %v6166_v14 = vor.u32 %v2730_v15, %v2729_v10 }
 0x197   : > { %v6182_v45 = vsel %vm2693_vm7, %v5918_v28, %v6166_v14  ;;  %v1677_v28 = vrot.slane %v6192_v31, 4 }
 0x199   : > { %v6208_v4 = vor.u32 %v1678_v49, %v1677_v28 }
 0x19b   : > { %4150 = vmatmul.mubr.msk.bf16.gmra.mrb[12].mxu1 %vm504_vm3, %v5781_v23  ;;  %4454 = vmatmul.mubr.msk.bf16.gmra.mrb[12].mxu0 %vm504_vm3, %v5792_v27  ;;  %v6216_v51 = vsel %vm1305_vm6, %v6170_v20, %v6208_v4 }
 0x19c   : > { %4153 = vmatprep.mubr.msk.bf16.mxu1 %vm5190_vm1, %v5189_v0  ;;  %4457 = vmatprep.mubr.msk.bf16.mxu0 %vm5190_vm1, %v5189_v0 }
 0x1a3   : > { %4154 = vmatmul.mubr.msk.bf16.gmra.mrb[16].mxu1 %vm504_vm3, %v5813_v40  ;;  %4458 = vmatmul.mubr.msk.bf16.gmra.mrb[16].mxu0 %vm504_vm3, %v5824_v50 }
 0x1a4   : > { %4157 = vmatprep.mubr.msk.bf16.mxu1 %vm5190_vm1, %v5189_v0  ;;  %4461 = vmatprep.mubr.msk.bf16.mxu0 %vm5190_vm1, %v5189_v0 }
 0x1ab   : > { %4158 = vmatmul.mubr.msk.bf16.gmra.mrb[20].mxu1 %vm504_vm3, %v5843_v63  ;;  %4462 = vmatmul.mubr.msk.bf16.gmra.mrb[20].mxu0 %vm504_vm3, %v5855_v11 }
 0x1ac   : > { %4161 = vmatprep.mubr.msk.bf16.mxu1 %vm5190_vm1, %v5189_v0  ;;  %4465 = vmatprep.mubr.msk.bf16.mxu0 %vm5190_vm1, %v5189_v0 }
 0x1b3   : > { %4162 = vmatmul.mubr.msk.bf16.gmra.mrb[24].mxu1 %vm504_vm3, %v5879_v21  ;;  %4466 = vmatmul.mubr.msk.bf16.gmra.mrb[24].mxu0 %vm504_vm3, %v5889_v54 }
 0x1b4   : > { %4165 = vmatprep.mubr.msk.bf16.mxu1 %vm5190_vm1, %v5189_v0  ;;  %4469 = vmatprep.mubr.msk.bf16.mxu0 %vm5190_vm1, %v5189_v0 }
 0x1bb   : > { %4166 = vmatmul.mubr.msk.bf16.gmra.mrb[28].mxu1 %vm504_vm3, %v5916_v24  ;;  %4470 = vmatmul.mubr.msk.bf16.gmra.mrb[28].mxu0 %vm504_vm3, %v5924_v32 }
 0x1bc   : > { %4169 = vmatprep.mubr.msk.bf16.mxu1 %vm5190_vm1, %v5189_v0  ;;  %4473 = vmatprep.mubr.msk.bf16.mxu0 %vm5190_vm1, %v5189_v0 }
 0x1c3   : > { %4170 = vmatmul.mubr.msk.bf16.gmra.mrb[32].mxu1 %vm504_vm3, %v6177_v25  ;;  %4474 = vmatmul.mubr.msk.bf16.gmra.mrb[32].mxu0 %vm504_vm3, %v6182_v45 }
 0x1c4   : > { %4175 = vmatprep.mubr.msk.bf16.mxu1 %vm5190_vm1, %v5189_v0  ;;  %4479 = vmatprep.mubr.msk.bf16.mxu0 %vm5190_vm1, %v5189_v0 }
 0x1cb   : > { %4176 = vmatmul.mubr.msk.bf16.vlgmr.msra.gmra.mrb[0].mxu1 %vm504_vm3, %v5960_v61  ;;  %4480 = vmatmul.mubr.msk.bf16.vlgmr.msra.gmra.mrb[0].mxu0 %vm504_vm3, %v5963_v46  ;;  %v2894_v61 = vrot.slane %v6139_v53, 1  ;;  %v2895_v46 = vrot.slane %v6142_v57, 2 }
 0x1cc   : > { %4212 = vmatpush3.bf16.msra.mxu1 %v1704_v13  ;;  %4516 = vmatpush3.bf16.msra.mxu0 %v3076_v17 }
 0x1cd   : > { %4179 = vmatprep.mubr.msk.bf16.mxu1 %vm5190_vm1, %v5189_v0  ;;  %4483 = vmatprep.mubr.msk.bf16.mxu0 %vm5190_vm1, %v5189_v0 }
 0x1d3   : > { %4180 = vmatmul.mubr.msk.bf16.gmra.mrb[4].mxu1 %vm504_vm3, %v5978_v42  ;;  %4484 = vmatmul.mubr.msk.bf16.gmra.mrb[4].mxu0 %vm504_vm3, %v5981_v26  ;;  %v1512_v42 = vor.u32 %v5886_v44, %v1142_v22  ;;  %v1513_v26 = vrot.slane %v6142_v57, 1  ;;  %v1518_v44 = vrot.slane %v6153_v33, 1 }
 0x1d4   : > { %4183 = vmatprep.mubr.msk.bf16.mxu1 %vm5190_vm1, %v5189_v0  ;;  %4487 = vmatprep.mubr.msk.bf16.mxu0 %vm5190_vm1, %v5189_v0 }
 0x1d5   : > { %v1515_v43 = vor.u32 %v1513_v26, %v6139_v53  ;;  %v1522_v9 = vor.u32 %v6156_v52, %v1518_v44 }
 0x1d7   : > { %v1519_v22 = vsel %vm1077_vm8, %v1515_v43, %v1518_v44  ;;  %v1527_v29 = vsel %vm1077_vm8, %v1522_v9, %v1526_v2 }
 0x1db   : > { %4184 = vmatmul.mubr.msk.bf16.gmra.mrb[8].mxu1 %vm504_vm3, %v5996_v7  ;;  %4488 = vmatmul.mubr.msk.bf16.gmra.mrb[8].mxu0 %vm504_vm3, %v5999_v56  ;;  %v2896_v7 = vor.u32 %v2895_v46, %v2894_v61  ;;  %v1514_v56 = vsel %vm1077_vm8, %v1512_v42, %v1513_v26 }
 0x1dc   : > { %4187 = vmatprep.mubr.msk.bf16.mxu1 %vm5190_vm1, %v5189_v0  ;;  %4491 = vmatprep.mubr.msk.bf16.mxu0 %vm5190_vm1, %v5189_v0 }
 0x1e3   : > { %4188 = vmatmul.mubr.msk.bf16.gmra.mrb[12].mxu1 %vm504_vm3, %v6014_v48  ;;  %4492 = vmatmul.mubr.msk.bf16.gmra.mrb[12].mxu0 %vm504_vm3, %v6017_v39  ;;  %v2897_v48 = vsel %vm2492_vm9, %v6049_v8, %v2896_v7  ;;  %v2898_v39 = vrot.slane %v6156_v52, 1 }
 0x1e4   : > { %4191 = vmatprep.mubr.msk.bf16.mxu1 %vm5190_vm1, %v5189_v0  ;;  %4495 = vmatprep.mubr.msk.bf16.mxu0 %vm5190_vm1, %v5189_v0 }
 0x1eb   : > { %4192 = vmatmul.mubr.msk.bf16.gmra.mrb[16].mxu1 %vm504_vm3, %v6032_v59  ;;  %4496 = vmatmul.mubr.msk.bf16.gmra.mrb[16].mxu0 %vm504_vm3, %v6035_v60  ;;  %v2899_v59 = vrot.slane %v6153_v33, 2 }
 0x1ec   : > { %4195 = vmatprep.mubr.msk.bf16.mxu1 %vm5190_vm1, %v5189_v0  ;;  %4499 = vmatprep.mubr.msk.bf16.mxu0 %vm5190_vm1, %v5189_v0 }
 0x1ed   : > { %v2900_v60 = vor.u32 %v2899_v59, %v2898_v39 }
 0x1ef   : > { %v2901_v8 = vsel %vm2492_vm9, %v2896_v7, %v2900_v60 }
 0x1f3   : > { %4196 = vmatmul.mubr.msk.bf16.gmra.mrb[20].mxu1 %vm504_vm3, %v6054_v41  ;;  %4500 = vmatmul.mubr.msk.bf16.gmra.mrb[20].mxu0 %vm504_vm3, %v6060_v58  ;;  %v2902_v41 = vrot.slane %v6192_v31, 1  ;;  %v2903_v58 = vrot.slane %v6189_v47, 2 }
 0x1f4   : > { %4199 = vmatprep.mubr.msk.bf16.mxu1 %vm5190_vm1, %v5189_v0  ;;  %4503 = vmatprep.mubr.msk.bf16.mxu0 %vm5190_vm1, %v5189_v0 }
 0x1f5   : > { %v2904_v12 = vor.u32 %v2903_v58, %v2902_v41 }
 0x1f7   : > { %v2905_v53 = vsel %vm2492_vm9, %v2900_v60, %v2904_v12 }
 0x1fb   : > { %4200 = vmatmul.mubr.msk.bf16.gmra.mrb[24].mxu1 %vm504_vm3, %v1514_v56  ;;  %4504 = vmatmul.mubr.msk.bf16.gmra.mrb[24].mxu0 %vm504_vm3, %v2897_v48 }
 0x1fc   : > { %4203 = vmatprep.mubr.msk.bf16.mxu1 %vm5190_vm1, %v5189_v0  ;;  %4507 = vmatprep.mubr.msk.bf16.mxu0 %vm5190_vm1, %v5189_v0 }
 0x203   : > { %4204 = vmatmul.mubr.msk.bf16.gmra.mrb[28].mxu1 %vm504_vm3, %v1519_v22  ;;  %4508 = vmatmul.mubr.msk.bf16.gmra.mrb[28].mxu0 %vm504_vm3, %v2901_v8 }
 0x204   : > { %4207 = vmatprep.mubr.msk.bf16.mxu1 %vm5190_vm1, %v5189_v0  ;;  %4511 = vmatprep.mubr.msk.bf16.mxu0 %vm5190_vm1, %v5189_v0 }
 0x20b   : > { %4208 = vmatmul.mubr.msk.bf16.gmra.mrb[32].mxu1 %vm504_vm3, %v1527_v29  ;;  %4512 = vmatmul.mubr.msk.bf16.gmra.mrb[32].mxu0 %vm504_vm3, %v2905_v53 }
 0x20c   : > { %4213 = vmatprep.mubr.msk.bf16.mxu1 %vm5190_vm1, %v5189_v0  ;;  %4517 = vmatprep.mubr.msk.bf16.mxu0 %vm5190_vm1, %v5189_v0 }
 0x213   : > { %4214 = vmatmul.mubr.msk.bf16.vlgmr.msra.gmra.mrb[0].mxu1 %vm504_vm3, %v5781_v23  ;;  %4518 = vmatmul.mubr.msk.bf16.vlgmr.msra.gmra.mrb[0].mxu0 %vm504_vm3, %v5792_v27  ;;  %v1674_v23 = vsel %vm1305_vm6, %v6162_v34, %v6170_v20  ;;  %v3052_v27 = vsel %vm2693_vm7, %v6166_v14, %v6184_v37  ;;  %v6400_v34 = vld [vmem:[%s6498_s4] ss:$0 sm:$0xff] }
 0x214   : > { %4217 = vmatprep.mubr.msk.bf16.mxu1 %vm5190_vm1, %v5189_v0  ;;  %4521 = vmatprep.mubr.msk.bf16.mxu0 %vm5190_vm1, %v5189_v0 }
 0x21b   : > { %4218 = vmatmul.mubr.msk.bf16.gmra.mrb[4].mxu1 %vm504_vm3, %v5813_v40  ;;  %4522 = vmatmul.mubr.msk.bf16.gmra.mrb[4].mxu0 %vm504_vm3, %v5824_v50  ;;  %v1681_v40 = vshrl.u32 %v5836_v55, 16  ;;  %v1684_v50 = vshll.u32 %v5836_v55, 16 }
 0x21c   : > { %4221 = vmatprep.mubr.msk.bf16.mxu1 %vm5190_vm1, %v5189_v0  ;;  %4525 = vmatprep.mubr.msk.bf16.mxu0 %vm5190_vm1, %v5189_v0 }
 0x223   : > { %4222 = vmatmul.mubr.msk.bf16.gmra.mrb[8].mxu1 %vm504_vm3, %v5843_v63  ;;  %4526 = vmatmul.mubr.msk.bf16.gmra.mrb[8].mxu0 %vm504_vm3, %v5855_v11  ;;  %v1683_v63 = vrot.slane %v1681_v40, 4  ;;  %v1686_v11 = vrot.slane %v1684_v50, 5 }
 0x224   : > { %4225 = vmatprep.mubr.msk.bf16.mxu1 %vm5190_vm1, %v5189_v0  ;;  %4529 = vmatprep.mubr.msk.bf16.mxu0 %vm5190_vm1, %v5189_v0 }
 0x225   : > { %v1687_v55 = vor.u32 %v1686_v11, %v1683_v63 }
 0x22b   : > { %4226 = vmatmul.mubr.msk.bf16.gmra.mrb[12].mxu1 %vm504_vm3, %v5879_v21  ;;  %4530 = vmatmul.mubr.msk.bf16.gmra.mrb[12].mxu0 %vm504_vm3, %v5889_v54  ;;  %v3057_v21 = vrot.slane %v1681_v40, 5  ;;  %v3058_v54 = vrot.slane %v1684_v50, 6 }
 0x22c   : > { %4229 = vmatprep.mubr.msk.bf16.mxu1 %vm5190_vm1, %v5189_v0  ;;  %4533 = vmatprep.mubr.msk.bf16.mxu0 %vm5190_vm1, %v5189_v0 }
 0x233   : > { %4230 = vmatmul.mubr.msk.bf16.gmra.mrb[16].mxu1 %vm504_vm3, %v5916_v24  ;;  %4534 = vmatmul.mubr.msk.bf16.gmra.mrb[16].mxu0 %vm504_vm3, %v5924_v32  ;;  %v3059_v24 = vor.u32 %v3058_v54, %v3057_v21  ;;  %v1688_v32 = vsel %vm1305_vm6, %v6208_v4, %v1687_v55 }
 0x234   : > { %4233 = vmatprep.mubr.msk.bf16.mxu1 %vm5190_vm1, %v5189_v0  ;;  %4537 = vmatprep.mubr.msk.bf16.mxu0 %vm5190_vm1, %v5189_v0 }
 0x235   : > { %v3060_v57 = vsel %vm2693_vm7, %v6218_v18, %v3059_v24 }
 0x23b   : > { %4234 = vmatmul.mubr.msk.bf16.gmra.mrb[20].mxu1 %vm504_vm3, %v6177_v25  ;;  %4538 = vmatmul.mubr.msk.bf16.gmra.mrb[20].mxu0 %vm504_vm3, %v6182_v45 }
 0x23c   : > { %4237 = vmatprep.mubr.msk.bf16.mxu1 %vm5190_vm1, %v5189_v0  ;;  %4541 = vmatprep.mubr.msk.bf16.mxu0 %vm5190_vm1, %v5189_v0 }
 0x243   : > { %4238 = vmatmul.mubr.msk.bf16.gmra.mrb[24].mxu1 %vm504_vm3, %v1674_v23  ;;  %4542 = vmatmul.mubr.msk.bf16.gmra.mrb[24].mxu0 %vm504_vm3, %v3052_v27 }
 0x244   : > { %4241 = vmatprep.mubr.msk.bf16.mxu1 %vm5190_vm1, %v5189_v0  ;;  %4545 = vmatprep.mubr.msk.bf16.mxu0 %vm5190_vm1, %v5189_v0 }
 0x24b   : > { %4242 = vmatmul.mubr.msk.bf16.gmra.mrb[28].mxu1 %vm504_vm3, %v6216_v51  ;;  %4546 = vmatmul.mubr.msk.bf16.gmra.mrb[28].mxu0 %vm504_vm3, %v6226_v16 }
 0x24c   : > { %4245 = vmatprep.mubr.msk.bf16.mxu1 %vm5190_vm1, %v5189_v0  ;;  %4549 = vmatprep.mubr.msk.bf16.mxu0 %vm5190_vm1, %v5189_v0  ;;  %v6395_v0 = vld [vmem:[%s6497_s3] ss:$0 sm:$0xff] }
 0x253   : > { %4246 = vmatmul.mubr.msk.bf16.gmra.mrb[32].mxu1 %vm504_vm3, %v1688_v32  ;;  %4550 = vmatmul.mubr.msk.bf16.gmra.mrb[32].mxu0 %vm504_vm3, %v3060_v57 }
 0x2e6   : > { %v1740_v1 = vpop.f32.mrb[0].mxu1  ;;  %v3112_v3 = vpop.f32.mrb[0].mxu0 }
 0x2e7   : > { %v4215_v10 = vpop.f32.mrb[1].mxu1  ;;  %v4553_v15 = vadd.f32 %v3112_v3, %v1740_v1  ;;  %v4519_v33 = vpop.f32.mrb[1].mxu0 }
 0x2e8   : > { %v1743_v52 = vpop.f32.mrb[2].mxu1  ;;  %v3115_v14 = vpop.f32.mrb[2].mxu0 }
 0x2e9   : > { %v4216_v19 = vpop.f32.mrb[3].mxu1  ;;  %v3208_v38 = vmul.f32 %v4553_v15, %v6395_v0  ;;  %v4554_v20 = vadd.f32 %v3115_v14, %v1743_v52  ;;  %v4520_v30 = vpop.f32.mrb[3].mxu0 }
 0x2eb   : > { %v3233_v36 = vadd.f32 %v6400_v34, %v3208_v38  ;;  %v3209_v25 = vmul.f32 %v4554_v20, %v6395_v0 }
 0x2ed   : > { %v3251_v45 = vmax.f32 %v3233_v36, 0.0  ;;  %v3234_v37 = vadd.f32 %v6400_v34, %v3209_v25 }
 0x2ee   : > { %v1748_v47 = vpop.f32.mrb[4].mxu1  ;;  %v3120_v31 = vpop.f32.mrb[4].mxu0 }
 0x2ef   : > { %v4219_v62 = vpop.f32.mrb[5].mxu1  ;;  %v3767_v28 = vpack.c.bf16 %v3251_v45, %v3251_v45  ;;  %v3252_v49 = vmax.f32 %v3234_v37, 0.0  ;;  %v4555_v35 = vadd.f32 %v3120_v31, %v1748_v47  ;;  %v4523_v4 = vpop.f32.mrb[5].mxu0 }
 0x2f0   : > { %v1751_v5 = vpop.f32.mrb[6].mxu1  ;;  %v3123_v6 = vpop.f32.mrb[6].mxu0 }
 0x2f1   : > { %v4220_v13 = vpop.f32.mrb[7].mxu1  ;;  %3342 = vst.msk [vmem:[%s6409_s18] sm:$0xf] %vm3341_vm10, %v3767_v28  ;;  %v3768_v51 = vpack.c.bf16 %v3252_v49, %v3252_v49  ;;  %v3210_v18 = vmul.f32 %v4555_v35, %v6395_v0  ;;  %v4556_v17 = vadd.f32 %v3123_v6, %v1751_v5  ;;  %v4524_v16 = vpop.f32.mrb[7].mxu0 }
 0x2f3   : > { %3343 = vst.msk [vmem:[%s6409_s18 + $0x4] sm:$0xf] %vm3341_vm10, %v3768_v51  ;;  %v3235_v61 = vadd.f32 %v6400_v34, %v3210_v18  ;;  %v3211_v46 = vmul.f32 %v4556_v17, %v6395_v0 }
 0x2f5   : > { %v3253_v42 = vmax.f32 %v3235_v61, 0.0  ;;  %v3236_v26 = vadd.f32 %v6400_v34, %v3211_v46 }
 0x2f6   : > { %v1756_v7 = vpop.f32.mrb[8].mxu1  ;;  %v3128_v56 = vpop.f32.mrb[8].mxu0 }
 0x2f7   : > { %v4223_v48 = vpop.f32.mrb[9].mxu1  ;;  %v3769_v39 = vpack.c.bf16 %v3253_v42, %v3253_v42  ;;  %v3254_v59 = vmax.f32 %v3236_v26, 0.0  ;;  %v4557_v43 = vadd.f32 %v3128_v56, %v1756_v7  ;;  %v4527_v44 = vpop.f32.mrb[9].mxu0 }
 0x2f8   : > { %v1759_v60 = vpop.f32.mrb[10].mxu1  ;;  %v3131_v22 = vpop.f32.mrb[10].mxu0 }
 0x2f9   : > { %v4224_v8 = vpop.f32.mrb[11].mxu1  ;;  %3344 = vst.msk [vmem:[%s6409_s18 + $0x8] sm:$0xf] %vm3341_vm10, %v3769_v39  ;;  %v3770_v41 = vpack.c.bf16 %v3254_v59, %v3254_v59  ;;  %v3212_v58 = vmul.f32 %v4557_v43, %v6395_v0  ;;  %v4558_v9 = vadd.f32 %v3131_v22, %v1759_v60  ;;  %v4528_v2 = vpop.f32.mrb[11].mxu0 }
 0x2fb   : > { %3345 = vst.msk [vmem:[%s6409_s18 + $0xc] sm:$0xf] %vm3341_vm10, %v3770_v41  ;;  %v3237_v12 = vadd.f32 %v6400_v34, %v3212_v58  ;;  %v3213_v29 = vmul.f32 %v4558_v9, %v6395_v0 }
 0x2fd   : > { %v3255_v53 = vmax.f32 %v3237_v12, 0.0  ;;  %v3238_v23 = vadd.f32 %v6400_v34, %v3213_v29 }
 0x2fe   : > { %v1764_v27 = vpop.f32.mrb[12].mxu1  ;;  %v3136_v40 = vpop.f32.mrb[12].mxu0 }
 0x2ff   : > { %v4227_v50 = vpop.f32.mrb[13].mxu1  ;;  %v3771_v63 = vpack.c.bf16 %v3255_v53, %v3255_v53  ;;  %v3256_v11 = vmax.f32 %v3238_v23, 0.0  ;;  %v4559_v21 = vadd.f32 %v3136_v40, %v1764_v27  ;;  %v4531_v54 = vpop.f32.mrb[13].mxu0 }
 0x300   : > { %v1767_v55 = vpop.f32.mrb[14].mxu1  ;;  %v3139_v24 = vpop.f32.mrb[14].mxu0 }
 0x301   : > { %v4228_v32 = vpop.f32.mrb[15].mxu1  ;;  %3346 = vst.msk [vmem:[%s6409_s18 + $0x10] sm:$0xf] %vm3341_vm10, %v3771_v63  ;;  %v3772_v57 = vpack.c.bf16 %v3256_v11, %v3256_v11  ;;  %v3214_v1 = vmul.f32 %v4559_v21, %v6395_v0  ;;  %v4560_v3 = vadd.f32 %v3139_v24, %v1767_v55  ;;  %v4532_v10 = vpop.f32.mrb[15].mxu0 }
 0x303   : > { %3347 = vst.msk [vmem:[%s6409_s18 + $0x14] sm:$0xf] %vm3341_vm10, %v3772_v57  ;;  %v3239_v15 = vadd.f32 %v6400_v34, %v3214_v1  ;;  %v3215_v33 = vmul.f32 %v4560_v3, %v6395_v0 }
 0x305   : > { %v3257_v52 = vmax.f32 %v3239_v15, 0.0  ;;  %v3240_v14 = vadd.f32 %v6400_v34, %v3215_v33 }
 0x306   : > { %v1772_v19 = vpop.f32.mrb[16].mxu1  ;;  %v3144_v38 = vpop.f32.mrb[16].mxu0 }
 0x307   : > { %v4231_v20 = vpop.f32.mrb[17].mxu1  ;;  %v3773_v30 = vpack.c.bf16 %v3257_v52, %v3257_v52  ;;  %v3258_v36 = vmax.f32 %v3240_v14, 0.0  ;;  %v4561_v25 = vadd.f32 %v3144_v38, %v1772_v19  ;;  %v4535_v45 = vpop.f32.mrb[17].mxu0 }
 0x308   : > { %v1775_v37 = vpop.f32.mrb[18].mxu1  ;;  %v3147_v47 = vpop.f32.mrb[18].mxu0 }
 0x309   : > { %v4232_v31 = vpop.f32.mrb[19].mxu1  ;;  %3348 = vst.msk [vmem:[%s6409_s18 + $0x18] sm:$0xf] %vm3341_vm10, %v3773_v30  ;;  %v3774_v62 = vpack.c.bf16 %v3258_v36, %v3258_v36  ;;  %v3216_v28 = vmul.f32 %v4561_v25, %v6395_v0  ;;  %v4562_v49 = vadd.f32 %v3147_v47, %v1775_v37  ;;  %v4536_v35 = vpop.f32.mrb[19].mxu0 }
 0x30b   : > { %3349 = vst.msk [vmem:[%s6409_s18 + $0x1c] sm:$0xf] %vm3341_vm10, %v3774_v62  ;;  %v3241_v4 = vadd.f32 %v6400_v34, %v3216_v28  ;;  %v3217_v5 = vmul.f32 %v4562_v49, %v6395_v0 }
 0x30d   : > { %v3259_v6 = vmax.f32 %v3241_v4, 0.0  ;;  %v3242_v13 = vadd.f32 %v6400_v34, %v3217_v5 }
 0x30e   : > { %v1780_v51 = vpop.f32.mrb[20].mxu1  ;;  %v3152_v18 = vpop.f32.mrb[20].mxu0 }
 0x30f   : > { %v4235_v17 = vpop.f32.mrb[21].mxu1  ;;  %v3775_v16 = vpack.c.bf16 %v3259_v6, %v3259_v6  ;;  %v3260_v61 = vmax.f32 %v3242_v13, 0.0  ;;  %v4563_v46 = vadd.f32 %v3152_v18, %v1780_v51  ;;  %v4539_v42 = vpop.f32.mrb[21].mxu0 }
 0x310   : > { %v1783_v26 = vpop.f32.mrb[22].mxu1  ;;  %v3155_v7 = vpop.f32.mrb[22].mxu0 }
 0x311   : > { %v4236_v56 = vpop.f32.mrb[23].mxu1  ;;  %3350 = vst.msk [vmem:[%s6409_s18 + $0x20] sm:$0xf] %vm3341_vm10, %v3775_v16  ;;  %v3776_v48 = vpack.c.bf16 %v3260_v61, %v3260_v61  ;;  %v3218_v39 = vmul.f32 %v4563_v46, %v6395_v0  ;;  %v4564_v59 = vadd.f32 %v3155_v7, %v1783_v26  ;;  %v4540_v43 = vpop.f32.mrb[23].mxu0 }
 0x313   : > { %3351 = vst.msk [vmem:[%s6409_s18 + $0x24] sm:$0xf] %vm3341_vm10, %v3776_v48  ;;  %v3243_v44 = vadd.f32 %v6400_v34, %v3218_v39  ;;  %v3219_v60 = vmul.f32 %v4564_v59, %v6395_v0 }
 0x315   : > { %v3261_v22 = vmax.f32 %v3243_v44, 0.0  ;;  %v3244_v8 = vadd.f32 %v6400_v34, %v3219_v60 }
 0x316   : > { %v1788_v41 = vpop.f32.mrb[24].mxu1  ;;  %v3160_v58 = vpop.f32.mrb[24].mxu0 }
 0x317   : > { %v4239_v9 = vpop.f32.mrb[25].mxu1  ;;  %v3777_v2 = vpack.c.bf16 %v3261_v22, %v3261_v22  ;;  %v3262_v12 = vmax.f32 %v3244_v8, 0.0  ;;  %v4565_v29 = vadd.f32 %v3160_v58, %v1788_v41  ;;  %v4543_v53 = vpop.f32.mrb[25].mxu0 }
 0x318   : > { %v1791_v23 = vpop.f32.mrb[26].mxu1  ;;  %v3163_v27 = vpop.f32.mrb[26].mxu0 }
 0x319   : > { %v4240_v40 = vpop.f32.mrb[27].mxu1  ;;  %3352 = vst.msk [vmem:[%s6409_s18 + $0x28] sm:$0xf] %vm3341_vm10, %v3777_v2  ;;  %v3778_v50 = vpack.c.bf16 %v3262_v12, %v3262_v12  ;;  %v3220_v63 = vmul.f32 %v4565_v29, %v6395_v0  ;;  %v4566_v11 = vadd.f32 %v3163_v27, %v1791_v23  ;;  %v4544_v21 = vpop.f32.mrb[27].mxu0 }
 0x31b   : > { %3353 = vst.msk [vmem:[%s6409_s18 + $0x2c] sm:$0xf] %vm3341_vm10, %v3778_v50  ;;  %v3245_v54 = vadd.f32 %v6400_v34, %v3220_v63  ;;  %v3221_v55 = vmul.f32 %v4566_v11, %v6395_v0 }
 0x31d   : > { %v3263_v24 = vmax.f32 %v3245_v54, 0.0  ;;  %v3246_v32 = vadd.f32 %v6400_v34, %v3221_v55 }
 0x31e   : > { %v1796_v57 = vpop.f32.mrb[28].mxu1  ;;  %v3168_v1 = vpop.f32.mrb[28].mxu0 }
 0x31f   : > { %v4243_v3 = vpop.f32.mrb[29].mxu1  ;;  %v3779_v10 = vpack.c.bf16 %v3263_v24, %v3263_v24  ;;  %v3264_v15 = vmax.f32 %v3246_v32, 0.0  ;;  %v4567_v33 = vadd.f32 %v3168_v1, %v1796_v57  ;;  %v4547_v52 = vpop.f32.mrb[29].mxu0 }
 0x320   : > { %v1799_v14 = vpop.f32.mrb[30].mxu1  ;;  %v3171_v19 = vpop.f32.mrb[30].mxu0 }
 0x321   : > { %v4244_v38 = vpop.f32.mrb[31].mxu1  ;;  %3354 = vst.msk [vmem:[%s6409_s18 + $0x30] sm:$0xf] %vm3341_vm10, %v3779_v10  ;;  %v3780_v20 = vpack.c.bf16 %v3264_v15, %v3264_v15  ;;  %v3222_v30 = vmul.f32 %v4567_v33, %v6395_v0  ;;  %v4568_v36 = vadd.f32 %v3171_v19, %v1799_v14  ;;  %v4548_v25 = vpop.f32.mrb[31].mxu0 }
 0x323   : > { %3355 = vst.msk [vmem:[%s6409_s18 + $0x34] sm:$0xf] %vm3341_vm10, %v3780_v20  ;;  %v3247_v45 = vadd.f32 %v6400_v34, %v3222_v30  ;;  %v3223_v37 = vmul.f32 %v4568_v36, %v6395_v0 }
 0x325   : > { %v3265_v47 = vmax.f32 %v3247_v45, 0.0  ;;  %v3248_v31 = vadd.f32 %v6400_v34, %v3223_v37 }
 0x326   : > { %v1804_v62 = vpop.f32.mrb[32].mxu1  ;;  %v3176_v28 = vpop.f32.mrb[32].mxu0 }
 0x327   : > { %v4247_v49 = vpop.f32.mrb[33].mxu1  ;;  %v3781_v35 = vpack.c.bf16 %v3265_v47, %v3265_v47  ;;  %v3266_v4 = vmax.f32 %v3248_v31, 0.0  ;;  %v4569_v5 = vadd.f32 %v3176_v28, %v1804_v62  ;;  %v4551_v6 = vpop.f32.mrb[33].mxu0 }
 0x328   : > { %v1807_v13 = vpop.f32.mrb[34].mxu1  ;;  %v3179_v51 = vpop.f32.mrb[34].mxu0 }
 0x329   : > { %v4248_v18 = vpop.f32.mrb[35].mxu1  ;;  %3356 = vst.msk [vmem:[%s6409_s18 + $0x38] sm:$0xf] %vm3341_vm10, %v3781_v35  ;;  %v3782_v17 = vpack.c.bf16 %v3266_v4, %v3266_v4  ;;  %v3224_v16 = vmul.f32 %v4569_v5, %v6395_v0  ;;  %v4570_v61 = vadd.f32 %v3179_v51, %v1807_v13  ;;  %v4552_v46 = vpop.f32.mrb[35].mxu0 }
 0x32b   : > { %3357 = vst.msk [vmem:[%s6409_s18 + $0x3c] sm:$0xf] %vm3341_vm10, %v3782_v17  ;;  %v3249_v42 = vadd.f32 %v6400_v34, %v3224_v16  ;;  %v3225_v26 = vmul.f32 %v4570_v61, %v6395_v0 }
 0x32d   : > { %v3267_v7 = vmax.f32 %v3249_v42, 0.0  ;;  %v3250_v56 = vadd.f32 %v6400_v34, %v3225_v26 }
 0x32f   : > { %v3783_v48 = vpack.c.bf16 %v3267_v7, %v3267_v7  ;;  %v3268_v39 = vmax.f32 %v3250_v56, 0.0 }
 0x331   : > { %3358 = vst.msk [vmem:[%s6409_s18 + $0x40] sm:$0xf] %vm3341_vm10, %v3783_v48  ;;  %v3784_v59 = vpack.c.bf16 %v3268_v39, %v3268_v39 }
 0x333   : > { %3359 = vst.msk [vmem:[%s6409_s18 + $0x44] sm:$0xf] %vm3341_vm10, %v3784_v59 }
 0x334 PF: > { %s15_s22 = sadd.s32 1, %s5187_s22   ;;  %s6500_s18 = smov %s5179_s20 }
 0x335   : > { %p12_p9 = scmp.ge.s32.totalorder %s15_s22, 8   ;;  %s6501_s19 = smov %s5183_s21 }
 0x336   : > { %s6502_s20 = smov %s6505_s23  ;;  %s6503_s21 = smov %s6509_s24 }
 0x337   :  { %14 = sbr.rel (!%p12_p9) target bundleno = 3 (0x3), region = 97 }

</bundles_post_ra>
